<compile_context>
chip_gen: v5e
topology: v5e:2x2
jax: 0.10.0
libtpu: 0.0.40
codegen_flags: <defaults>
</compile_context>

<pallas_src>
import functools

import jax
import jax.numpy as jnp
from jax.experimental import pallas as pl
from jax.experimental.pallas import tpu as pltpu

NUM_NEURONS = 16
NUM_LAYERS = 9                       # PyTorch default
NUM_HIDDEN = NUM_LAYERS - 1          # 8 bias-free hidden Linear+Tanh blocks
IN_DIM = 2
OUT_DIM = 3
NUM_PARAM_SLOTS = NUM_HIDDEN + 2     # [w0|b0], 8 x wh, wo(padded)

LANE_QUANTUM = 512                   # tile_n is always a multiple of this
MAX_TILE_N = 16384                   # sweep point in the 8K-32K range


def mlp_kernel(x_ref, p_ref, o_ref, *, act_dtype, dot_dtype):
    # x_ref: (IN_DIM, tile_n) f32  -- points on lanes, features on sublanes
    # p_ref: (NUM_PARAM_SLOTS, 16, 16) f32 packed weights, (out, in) layout
    # o_ref: (OUT_DIM, tile_n)

    # ---- first layer: K=2 contraction on the VPU, fully f32 (coordinates
    #      are never quantized to bf16) ----
    p0 = p_ref[0]                                   # (16, 16) f32
    w0_c0 = p0[:, 0:1]                              # (16, 1)
    w0_c1 = p0[:, 1:2]                              # (16, 1)
    b0 = p0[:, IN_DIM:IN_DIM + 1]                   # (16, 1)
    x0 = x_ref[0:1, :]                              # (1, tile_n) f32
    x1 = x_ref[1:2, :]
    acc = w0_c0 * x0 + w0_c1 * x1 + b0              # (16, tile_n) f32
    h = jnp.tanh(acc.astype(act_dtype))

    # ---- 8 bias-free hidden layers (statically unrolled):
    #      bf16/f32 MXU operands, f32 accumulation, tanh in act_dtype ----
    for l in range(NUM_HIDDEN):
        w = p_ref[1 + l].astype(dot_dtype)          # (16, 16) (out, in)
        acc = jnp.dot(w, h.astype(dot_dtype),
                      preferred_element_type=jnp.float32)
        h = jnp.tanh(acc.astype(act_dtype))

    # ---- output layer: (3, 16) @ (16, tile_n), sigmoid in f32 ----
    wo = p_ref[1 + NUM_HIDDEN][:OUT_DIM, :].astype(dot_dtype)
    logits = jnp.dot(wo, h.astype(dot_dtype),
                     preferred_element_type=jnp.float32)
    o_ref[...] = jax.nn.sigmoid(logits).astype(o_ref.dtype)


def pack_params(w0, b0, wh, wo):
    """Pack all weights into one f32 (NUM_PARAM_SLOTS, 16, 16) slab, (out, in).

    slot 0      : columns 0..1 = w0.T (16, 2), column 2 = b0 (16,)
    slots 1..8  : wh[l].T  (out, in)
    slot 9      : rows 0..2 = wo.T (3, 16), rest zero
    """
    p = jnp.zeros((NUM_PARAM_SLOTS, NUM_NEURONS, NUM_NEURONS), jnp.float32)
    slot0 = jnp.zeros((NUM_NEURONS, NUM_NEURONS), jnp.float32)
    slot0 = slot0.at[:, :IN_DIM].set(w0.T.astype(jnp.float32))
    slot0 = slot0.at[:, IN_DIM].set(b0.reshape(-1).astype(jnp.float32))
    p = p.at[0].set(slot0)
    p = p.at[1:1 + NUM_HIDDEN].set(
        jnp.transpose(wh.astype(jnp.float32), (0, 2, 1)))
    slot_out = jnp.zeros((NUM_NEURONS, NUM_NEURONS), jnp.float32)
    slot_out = slot_out.at[:OUT_DIM, :].set(wo.T.astype(jnp.float32))
    p = p.at[1 + NUM_HIDDEN].set(slot_out)
    return p


def _ceil_to(x, m):
    return ((x + m - 1) // m) * m


def _choose_tile_n(n):
    """Large lane-dense tiles; even >=4-step grids at large N (v7x 2 TCs)."""
    steps = max(1, -(-n // MAX_TILE_N))
    if steps > 1:
        if steps < 4:
            steps = 4            # >= 2 grid steps per TensorCore on v7x
        elif steps % 2:
            steps += 1           # keep the two TensorCores balanced
    return _ceil_to(-(-n // steps), LANE_QUANTUM)


def _auto_dtypes():
    kind = jax.devices()[0].device_kind.lower()
    bf16_eup = any(tag in kind for tag in ("v6", "v7", "7x"))
    act = jnp.bfloat16 if bf16_eup else jnp.float32   # v5e: no bf16 EUP
    dot = jnp.bfloat16   # K=16 with f32 accumulate: single-pass MXU everywhere
    return act, dot


@functools.partial(
    jax.jit,
    static_argnames=("tile_n", "act_dtype", "dot_dtype", "out_dtype",
                     "transpose_output"))
def nn_forward(x, w0, b0, wh, wo, *, tile_n=None, act_dtype=None,
               dot_dtype=None, out_dtype=jnp.float32, transpose_output=True):
    """x: (N, 2) f32 -> (N, 3) (or (3, N) if transpose_output=False)."""
    N = x.shape[0]

    if act_dtype is None or dot_dtype is None:
        auto_act, auto_dot = _auto_dtypes()
        act_dtype = auto_act if act_dtype is None else act_dtype
        dot_dtype = auto_dot if dot_dtype is None else dot_dtype

    if tile_n is None:
        tile_n = _choose_tile_n(N)
    n_pad = _ceil_to(N, tile_n)

    # Under jit, transpose+pad fuse into one XLA copy.  x stays f32 (no
    # coordinate quantization).  The padded tail computes per-point garbage
    # that is sliced off below -- safe because there is no cross-point
    # reduction anywhere in this network.
    x_t = jnp.pad(x.astype(jnp.float32).T, ((0, 0), (0, n_pad - N)))
    params = pack_params(w0, b0, wh, wo)
    grid = (n_pad // tile_n,)

    kernel = functools.partial(mlp_kernel, act_dtype=act_dtype,
                               dot_dtype=dot_dtype)

    out_t = pl.pallas_call(
        kernel,
        out_shape=jax.ShapeDtypeStruct((OUT_DIM, n_pad), out_dtype),
        grid_spec=pltpu.PrefetchScalarGridSpec(
            num_scalar_prefetch=0,
            grid=grid,
            in_specs=[
                pl.BlockSpec((IN_DIM, tile_n), lambda i: (0, i)),
                pl.BlockSpec((NUM_PARAM_SLOTS, NUM_NEURONS, NUM_NEURONS),
                             lambda i: (0, 0, 0)),
            ],
            out_specs=pl.BlockSpec((OUT_DIM, tile_n), lambda i: (0, i)),
        ),
        compiler_params=pltpu.CompilerParams(
            dimension_semantics=("parallel",)),
    )(x_t, params)

    out_t = out_t[:, :N]
    # (3, N) is the kernel-native lane-dense layout; only materialize the
    # PyTorch-compatible (N, 3) view if asked (fuses with the slice under jit).
    return out_t.T if transpose_output else out_t


def init_params(key):
    """PyTorch Linear default init: U(-1/sqrt(fan_in), 1/sqrt(fan_in))."""
    k0, kb, kh, ko = jax.random.split(key, 4)
    bound0 = 1.0 / jnp.sqrt(IN_DIM)
    w0 = jax.random.uniform(k0, (IN_DIM, NUM_NEURONS), jnp.float32,
                            -bound0, bound0)
    b0 = jax.random.uniform(kb, (1, NUM_NEURONS), jnp.float32,
                            -bound0, bound0)
    bound_h = 1.0 / jnp.sqrt(NUM_NEURONS)
    wh = jax.random.uniform(kh, (NUM_HIDDEN, NUM_NEURONS, NUM_NEURONS),
                            jnp.float32, -bound_h, bound_h)
    wo = jax.random.uniform(ko, (NUM_NEURONS, OUT_DIM), jnp.float32,
                            -bound_h, bound_h)
    return w0, b0, wh, wo


def reference_forward(x, w0, b0, wh, wo):
    h = jnp.tanh(x @ w0 + b0)
    for l in range(NUM_HIDDEN):
        h = jnp.tanh(h @ wh[l])
    return jax.nn.sigmoid(h @ wo)


if __name__ == "__main__":
    key = jax.random.PRNGKey(0)
    kx, kp = jax.random.split(key)
    N = 1024  # e.g. 1024 (x, y) coordinate pairs
    x = jax.random.uniform(kx, (N, IN_DIM), jnp.float32, -1.0, 1.0)
    w0, b0, wh, wo = init_params(kp)
    ref = reference_forward(x, w0, b0, wh, wo)

    # Strict check: fully-f32 compute path.
    out_f32 = jax.block_until_ready(
        nn_forward(x, w0, b0, wh, wo,
                   act_dtype=jnp.float32, dot_dtype=jnp.float32))
    assert out_f32.shape == (N, OUT_DIM)
    assert jnp.allclose(out_f32, ref, atol=1e-5, rtol=1e-5), \
        "f32 kernel mismatch vs JAX reference"

    # Device-tuned path (bf16 dot operands everywhere; bf16 tanh on v6e/v7x).
    out_auto = jax.block_until_ready(nn_forward(x, w0, b0, wh, wo))
    assert out_auto.shape == (N, OUT_DIM)
    assert jnp.allclose(out_auto, ref, atol=5e-2, rtol=5e-2), \
        "auto-dtype kernel mismatch vs JAX reference"

    # Kernel-native (3, N) output layout (no trailing transpose pass).
    out_t = jax.block_until_ready(
        nn_forward(x, w0, b0, wh, wo, transpose_output=False))
    assert out_t.shape == (OUT_DIM, N)
    assert jnp.allclose(out_t.T, out_auto, atol=1e-6), \
        "layout-preserving output mismatch"

    # Ragged N exercises the pad-to-tile path.
    N2 = 300
    x2 = jax.random.uniform(jax.random.PRNGKey(1), (N2, IN_DIM),
                            jnp.float32, -1.0, 1.0)
    out2 = jax.block_until_ready(
        nn_forward(x2, w0, b0, wh, wo,
                   act_dtype=jnp.float32, dot_dtype=jnp.float32))
    ref2 = reference_forward(x2, w0, b0, wh, wo)
    assert out2.shape == (N2, OUT_DIM)
    assert jnp.allclose(out2, ref2, atol=1e-5, rtol=1e-5), \
        "padded-N kernel mismatch vs JAX reference"

    print("KERNEL_OK")
</pallas_src>

<mosaic_0001>
module attributes {stable_mosaic.version = 11 : i64} {
  func.func @mlp_kernel(%arg0: i32, %arg1: memref<2x1024xf32, #tpu.memory_space<vmem>>, %arg2: memref<10x16x16xf32, #tpu.memory_space<vmem>>, %arg3: memref<3x1024xf32, #tpu.memory_space<vmem>>) attributes {dimension_semantics = [#tpu.dimension_semantics<parallel>], iteration_bounds = array<i64: 1>, scalar_prefetch = 0 : i64, scratch_operands = 0 : i64, tpu.core_type = #tpu.core_type<tc>, window_params = [{transform_indices = @transform_0, window_bounds = array<i64: 2, 1024>}, {pipeline_mode = #tpu.pipeline_mode<synchronous>, transform_indices = @transform_1, window_bounds = array<i64: 10, 16, 16>}, {transform_indices = @transform_2, window_bounds = array<i64: 3, 1024>}]} {
    %c0 = arith.constant 0 : index
    %c0_0 = arith.constant 0 : index
    %c0_1 = arith.constant 0 : index
    %0 = vector.load %arg2[%c0, %c0_0, %c0_1] : memref<10x16x16xf32, #tpu.memory_space<vmem>>, vector<1x16x16xf32>
    %1 = vector.shape_cast %0 : vector<1x16x16xf32> to vector<16x16xf32>
    %2 = vector.extract_strided_slice %1 {offsets = [0, 0], sizes = [16, 1], strides = [1, 1]} : vector<16x16xf32> to vector<16x1xf32>
    %3 = vector.extract_strided_slice %1 {offsets = [0, 1], sizes = [16, 1], strides = [1, 1]} : vector<16x16xf32> to vector<16x1xf32>
    %4 = vector.extract_strided_slice %1 {offsets = [0, 2], sizes = [16, 1], strides = [1, 1]} : vector<16x16xf32> to vector<16x1xf32>
    %c0_2 = arith.constant 0 : index
    %c0_3 = arith.constant 0 : index
    %5 = vector.load %arg1[%c0_2, %c0_3] : memref<2x1024xf32, #tpu.memory_space<vmem>>, vector<1x1024xf32>
    %c1 = arith.constant 1 : index
    %c0_4 = arith.constant 0 : index
    %6 = vector.load %arg1[%c1, %c0_4] : memref<2x1024xf32, #tpu.memory_space<vmem>>, vector<1x1024xf32>
    %7 = vector.broadcast %2 : vector<16x1xf32> to vector<16x1024xf32>
    %8 = vector.broadcast %5 : vector<1x1024xf32> to vector<16x1024xf32>
    %9 = arith.mulf %7, %8 : vector<16x1024xf32>
    %10 = vector.broadcast %3 : vector<16x1xf32> to vector<16x1024xf32>
    %11 = vector.broadcast %6 : vector<1x1024xf32> to vector<16x1024xf32>
    %12 = arith.mulf %10, %11 : vector<16x1024xf32>
    %13 = arith.addf %9, %12 : vector<16x1024xf32>
    %14 = vector.broadcast %4 : vector<16x1xf32> to vector<16x1024xf32>
    %15 = arith.addf %13, %14 : vector<16x1024xf32>
    %16 = math.tanh %15 : vector<16x1024xf32>
    %c1_5 = arith.constant 1 : index
    %c0_6 = arith.constant 0 : index
    %c0_7 = arith.constant 0 : index
    %17 = vector.load %arg2[%c1_5, %c0_6, %c0_7] : memref<10x16x16xf32, #tpu.memory_space<vmem>>, vector<1x16x16xf32>
    %18 = vector.shape_cast %17 : vector<1x16x16xf32> to vector<16x16xf32>
    %cst = arith.constant dense<0.000000e+00> : vector<16x1024xf32>
    %19 = tpu.matmul %18, %16, %cst {dimension_numbers = #tpu.dot_dimension_numbers<[1], [0], [0], [1], [0, 0, 1, 1], [], []>} : vector<16x16xf32>, vector<16x1024xf32>, vector<16x1024xf32> -> vector<16x1024xf32>
    %20 = math.tanh %19 : vector<16x1024xf32>
    %c2 = arith.constant 2 : index
    %c0_8 = arith.constant 0 : index
    %c0_9 = arith.constant 0 : index
    %21 = vector.load %arg2[%c2, %c0_8, %c0_9] : memref<10x16x16xf32, #tpu.memory_space<vmem>>, vector<1x16x16xf32>
    %22 = vector.shape_cast %21 : vector<1x16x16xf32> to vector<16x16xf32>
    %cst_10 = arith.constant dense<0.000000e+00> : vector<16x1024xf32>
    %23 = tpu.matmul %22, %20, %cst_10 {dimension_numbers = #tpu.dot_dimension_numbers<[1], [0], [0], [1], [0, 0, 1, 1], [], []>} : vector<16x16xf32>, vector<16x1024xf32>, vector<16x1024xf32> -> vector<16x1024xf32>
    %24 = math.tanh %23 : vector<16x1024xf32>
    %c3 = arith.constant 3 : index
    %c0_11 = arith.constant 0 : index
    %c0_12 = arith.constant 0 : index
    %25 = vector.load %arg2[%c3, %c0_11, %c0_12] : memref<10x16x16xf32, #tpu.memory_space<vmem>>, vector<1x16x16xf32>
    %26 = vector.shape_cast %25 : vector<1x16x16xf32> to vector<16x16xf32>
    %cst_13 = arith.constant dense<0.000000e+00> : vector<16x1024xf32>
    %27 = tpu.matmul %26, %24, %cst_13 {dimension_numbers = #tpu.dot_dimension_numbers<[1], [0], [0], [1], [0, 0, 1, 1], [], []>} : vector<16x16xf32>, vector<16x1024xf32>, vector<16x1024xf32> -> vector<16x1024xf32>
    %28 = math.tanh %27 : vector<16x1024xf32>
    %c4 = arith.constant 4 : index
    %c0_14 = arith.constant 0 : index
    %c0_15 = arith.constant 0 : index
    %29 = vector.load %arg2[%c4, %c0_14, %c0_15] : memref<10x16x16xf32, #tpu.memory_space<vmem>>, vector<1x16x16xf32>
    %30 = vector.shape_cast %29 : vector<1x16x16xf32> to vector<16x16xf32>
    %cst_16 = arith.constant dense<0.000000e+00> : vector<16x1024xf32>
    %31 = tpu.matmul %30, %28, %cst_16 {dimension_numbers = #tpu.dot_dimension_numbers<[1], [0], [0], [1], [0, 0, 1, 1], [], []>} : vector<16x16xf32>, vector<16x1024xf32>, vector<16x1024xf32> -> vector<16x1024xf32>
    %32 = math.tanh %31 : vector<16x1024xf32>
    %c5 = arith.constant 5 : index
    %c0_17 = arith.constant 0 : index
    %c0_18 = arith.constant 0 : index
    %33 = vector.load %arg2[%c5, %c0_17, %c0_18] : memref<10x16x16xf32, #tpu.memory_space<vmem>>, vector<1x16x16xf32>
    %34 = vector.shape_cast %33 : vector<1x16x16xf32> to vector<16x16xf32>
    %cst_19 = arith.constant dense<0.000000e+00> : vector<16x1024xf32>
    %35 = tpu.matmul %34, %32, %cst_19 {dimension_numbers = #tpu.dot_dimension_numbers<[1], [0], [0], [1], [0, 0, 1, 1], [], []>} : vector<16x16xf32>, vector<16x1024xf32>, vector<16x1024xf32> -> vector<16x1024xf32>
    %36 = math.tanh %35 : vector<16x1024xf32>
    %c6 = arith.constant 6 : index
    %c0_20 = arith.constant 0 : index
    %c0_21 = arith.constant 0 : index
    %37 = vector.load %arg2[%c6, %c0_20, %c0_21] : memref<10x16x16xf32, #tpu.memory_space<vmem>>, vector<1x16x16xf32>
    %38 = vector.shape_cast %37 : vector<1x16x16xf32> to vector<16x16xf32>
    %cst_22 = arith.constant dense<0.000000e+00> : vector<16x1024xf32>
    %39 = tpu.matmul %38, %36, %cst_22 {dimension_numbers = #tpu.dot_dimension_numbers<[1], [0], [0], [1], [0, 0, 1, 1], [], []>} : vector<16x16xf32>, vector<16x1024xf32>, vector<16x1024xf32> -> vector<16x1024xf32>
    %40 = math.tanh %39 : vector<16x1024xf32>
    %c7 = arith.constant 7 : index
    %c0_23 = arith.constant 0 : index
    %c0_24 = arith.constant 0 : index
    %41 = vector.load %arg2[%c7, %c0_23, %c0_24] : memref<10x16x16xf32, #tpu.memory_space<vmem>>, vector<1x16x16xf32>
    %42 = vector.shape_cast %41 : vector<1x16x16xf32> to vector<16x16xf32>
    %cst_25 = arith.constant dense<0.000000e+00> : vector<16x1024xf32>
    %43 = tpu.matmul %42, %40, %cst_25 {dimension_numbers = #tpu.dot_dimension_numbers<[1], [0], [0], [1], [0, 0, 1, 1], [], []>} : vector<16x16xf32>, vector<16x1024xf32>, vector<16x1024xf32> -> vector<16x1024xf32>
    %44 = math.tanh %43 : vector<16x1024xf32>
    %c8 = arith.constant 8 : index
    %c0_26 = arith.constant 0 : index
    %c0_27 = arith.constant 0 : index
    %45 = vector.load %arg2[%c8, %c0_26, %c0_27] : memref<10x16x16xf32, #tpu.memory_space<vmem>>, vector<1x16x16xf32>
    %46 = vector.shape_cast %45 : vector<1x16x16xf32> to vector<16x16xf32>
    %cst_28 = arith.constant dense<0.000000e+00> : vector<16x1024xf32>
    %47 = tpu.matmul %46, %44, %cst_28 {dimension_numbers = #tpu.dot_dimension_numbers<[1], [0], [0], [1], [0, 0, 1, 1], [], []>} : vector<16x16xf32>, vector<16x1024xf32>, vector<16x1024xf32> -> vector<16x1024xf32>
    %48 = math.tanh %47 : vector<16x1024xf32>
    %c9 = arith.constant 9 : index
    %c0_29 = arith.constant 0 : index
    %c0_30 = arith.constant 0 : index
    %49 = vector.load %arg2[%c9, %c0_29, %c0_30] : memref<10x16x16xf32, #tpu.memory_space<vmem>>, vector<1x16x16xf32>
    %50 = vector.shape_cast %49 : vector<1x16x16xf32> to vector<16x16xf32>
    %51 = vector.extract_strided_slice %50 {offsets = [0, 0], sizes = [3, 16], strides = [1, 1]} : vector<16x16xf32> to vector<3x16xf32>
    %cst_31 = arith.constant dense<0.000000e+00> : vector<3x1024xf32>
    %52 = tpu.matmul %51, %48, %cst_31 {dimension_numbers = #tpu.dot_dimension_numbers<[1], [0], [0], [1], [0, 0, 1, 1], [], []>} : vector<3x16xf32>, vector<16x1024xf32>, vector<3x1024xf32> -> vector<3x1024xf32>
    %53 = arith.negf %52 : vector<3x1024xf32>
    %54 = math.exp %53 : vector<3x1024xf32>
    %cst_32 = arith.constant 1.000000e+00 : f32
    %55 = vector.broadcast %cst_32 : f32 to vector<3x1024xf32>
    %56 = arith.addf %55, %54 : vector<3x1024xf32>
    %57 = arith.divf %55, %56 : vector<3x1024xf32>
    %c0_33 = arith.constant 0 : index
    %c0_34 = arith.constant 0 : index
    %58 = vector.load %arg3[%c0_33, %c0_34] : memref<3x1024xf32, #tpu.memory_space<vmem>>, vector<3x1024xf32>
    tpu.vector_store %arg3[%c0_33, %c0_34], %57 {strides = array<i32>} : memref<3x1024xf32, #tpu.memory_space<vmem>>, vector<3x1024xf32>,
    return
  }
  func.func @transform_0(%arg0: i32) -> (i32, i32) {
    %c0_i32 = arith.constant 0 : i32
    %c0_i32_0 = arith.constant 0 : i32
    return %c0_i32, %arg0 : i32, i32
  }
  func.func @transform_1(%arg0: i32) -> (i32, i32, i32) {
    %c0_i32 = arith.constant 0 : i32
    %c0_i32_0 = arith.constant 0 : i32
    %c0_i32_1 = arith.constant 0 : i32
    %c0_i32_2 = arith.constant 0 : i32
    return %c0_i32, %c0_i32_0, %c0_i32_1 : i32, i32, i32
  }
  func.func @transform_2(%arg0: i32) -> (i32, i32) {
    %c0_i32 = arith.constant 0 : i32
    %c0_i32_0 = arith.constant 0 : i32
    return %c0_i32, %arg0 : i32, i32
  }
}

</mosaic_0001>

<bundles_post_ra>
// kernel: nn_forward.1
= control target key start
LH: loop header
LB: loop body
LE: loop exit
PB: predicated region body
PF: predicated region fallthrough
CT: control target
= control target key end

     0   :  { %v2706_v2 = vmov 0   ;;  %s3073_s0 = inlined_call_operand.vmem [shape: f32[2,1024], index: 0, kind: input, shape index: {}]   ;;  %s3074_s1 = inlined_call_operand.vmem [shape: f32[10,16,16], index: 1, kind: input, shape index: {}]   ;;  %s3075_s2 = inlined_call_operand.hbm [shape: f32[3,1024], index: 2, kind: output, shape index: {}]  }
   0x1   :  { %v13_v0 = vld [vmem:[%s3074_s1 + $0x8] sm:$0xff]  ;;  %v12_v1 = vld [vmem:[%s3074_s1] sm:$0xff]  ;;  %2356 = vset.pattern.permute.xlu1 %v2706_v2  ;;  %2354 = vset.pattern.permute.xlu0 %v2706_v2 }
   0x2   :  { %7 = vsyncpa [#allocation3], 0  ;;  %24 = vperm.xlu0 %2354, %v13_v0   ;;  %19 = vperm.xlu1 %2356, %v12_v1   ;;  %v2707_v3 = vmov 2   ;;  %v2708_v4 = vmov 1   ;;  %v2736_v7 = vld [vmem:[%s3073_s0] ss:$2 sm:$0xff] }
   0x3   :  { %2358 = vset.pattern.permute.xlu2 %v2707_v3  ;;  %v2741_v8 = vld [vmem:[%s3073_s0 + $0x1] ss:$2 sm:$0xff]  ;;  %v28_v10 = vperm.slane %v2736_v7, 0  ;;  %v29_v11 = vperm.slane %v2736_v7, 1  ;;  %v30_v12 = vperm.slane %v2736_v7, 2  ;;  %v31_v13 = vperm.slane %v2736_v7, 3 }
   0x4   :  { %122 = vperm.xlu2 %2358, %v13_v0   ;;  %v69_v14 = vperm.slane %v2741_v8, 0  ;;  %v70_v15 = vperm.slane %v2741_v8, 1  ;;  %v32_v16 = vperm.slane %v2736_v7, 4  ;;  %v33_v17 = vperm.slane %v2736_v7, 5  ;;  %s2179_s24 = sshll.u32 %s3075_s2, 4  ;;  %s2180_s24 = int_to_ptr.hbm [resolvable:$true] %s2179_s24 }
   0x5   :  { %v71_v18 = vperm.slane %v2741_v8, 2  ;;  %v72_v19 = vperm.slane %v2741_v8, 3  ;;  %v34_v20 = vperm.slane %v2736_v7, 6  ;;  %v35_v21 = vperm.slane %v2736_v7, 7 }
   0x6   :  { %v73_v22 = vperm.slane %v2741_v8, 4  ;;  %v74_v23 = vperm.slane %v2741_v8, 5  ;;  %v75_v24 = vperm.slane %v2741_v8, 6  ;;  %v76_v25 = vperm.slane %v2741_v8, 7 }
   0x7   :  { %vm160_vm0 = vcmask 130048   ;;  %vm2159_vm11 = vcmask 1043456  }
   0xa   :  { %2355 = vset.pattern.permute.xlu0 %v2708_v4  ;;  %2357 = vset.pattern.permute.xlu1 %v2708_v4 }
   0xb   :  { %65 = vperm.xlu0 %2355, %v13_v0   ;;  %61 = vperm.xlu1 %2357, %v12_v1  }
   0xc   :  { %118 = vperm.xlu2 %2358, %v12_v1  }
  0x13   :  { %2359 = vset.pattern.permute.xlu0 %v2707_v3 }
  0x5e   :  { %v2743_v9 = vpop.permute.xlu2 %122 }
  0x66   :  { %v2771_v52 = vpop.permute.xlu2 %118 }
  0x74   :  { %v25_v5 = vpop.permute.xlu0 %24  ;;  %v2731_v6 = vpop.permute.xlu1 %19 }
  0x75   :  { %v44_v26 = vmul.f32 %v28_v10, %v2731_v6  ;;  %v52_v27 = vmul.f32 %v28_v10, %v25_v5  ;;  %v45_v28 = vmul.f32 %v29_v11, %v2731_v6  ;;  %v53_v29 = vmul.f32 %v29_v11, %v25_v5 }
  0x76   :  { %v46_v30 = vmul.f32 %v30_v12, %v2731_v6  ;;  %v54_v31 = vmul.f32 %v30_v12, %v25_v5  ;;  %v47_v32 = vmul.f32 %v31_v13, %v2731_v6  ;;  %v55_v33 = vmul.f32 %v31_v13, %v25_v5 }
  0x77   :  { %v56_v36 = vmul.f32 %v32_v16, %v25_v5  ;;  %v57_v37 = vmul.f32 %v33_v17, %v25_v5  ;;  %v58_v38 = vmul.f32 %v34_v20, %v25_v5  ;;  %v59_v39 = vmul.f32 %v35_v21, %v25_v5 }
  0x78   :  { %v48_v56 = vmul.f32 %v32_v16, %v2731_v6  ;;  %v49_v16 = vmul.f32 %v33_v17, %v2731_v6 }
  0x7d   :  { %v66_v34 = vpop.permute.xlu0 %65  ;;  %v62_v35 = vpop.permute.xlu1 %61 }
  0x7e   :  { %v85_v40 = vmul.f32 %v69_v14, %v62_v35  ;;  %v93_v41 = vmul.f32 %v69_v14, %v66_v34  ;;  %v86_v42 = vmul.f32 %v70_v15, %v62_v35  ;;  %v94_v43 = vmul.f32 %v70_v15, %v66_v34 }
  0x7f   :  { %v87_v44 = vmul.f32 %v71_v18, %v62_v35  ;;  %v95_v45 = vmul.f32 %v71_v18, %v66_v34  ;;  %v88_v46 = vmul.f32 %v72_v19, %v62_v35  ;;  %v96_v47 = vmul.f32 %v72_v19, %v66_v34 }
  0x80   :  { %v109_v48 = vadd.f32 %v93_v41, %v52_v27  ;;  %v110_v49 = vadd.f32 %v94_v43, %v53_v29  ;;  %v101_v50 = vadd.f32 %v85_v40, %v44_v26  ;;  %v102_v51 = vadd.f32 %v86_v42, %v45_v28 }
  0x81   :  { %v111_v53 = vadd.f32 %v95_v45, %v54_v31  ;;  %v112_v54 = vadd.f32 %v96_v47, %v55_v33  ;;  %v103_v55 = vadd.f32 %v87_v44, %v46_v30  ;;  %v104_v60 = vadd.f32 %v88_v46, %v47_v32  ;;  %v2190_v44 = vld [vmem:[%s3074_s1 + $0x18] sm:$0xff] }
  0x82   :  { %v133_v57 = vadd.f32 %v2743_v9, %v109_v48  ;;  %v134_v58 = vadd.f32 %v2743_v9, %v110_v49  ;;  %v125_v59 = vadd.f32 %v2771_v52, %v101_v50  ;;  %v126_v63 = vadd.f32 %v2771_v52, %v102_v51 }
  0x83   :  { %v135_v61 = vadd.f32 %v2743_v9, %v111_v53  ;;  %v136_v62 = vadd.f32 %v2743_v9, %v112_v54  ;;  %v127_v0 = vadd.f32 %v2771_v52, %v103_v55  ;;  %v97_v1 = vmul.f32 %v73_v22, %v66_v34 }
  0x84   :  { %2360 = vtanh.f32 %v133_v57  ;;  %v98_v2 = vmul.f32 %v74_v23, %v66_v34  ;;  %v99_v3 = vmul.f32 %v75_v24, %v66_v34  ;;  %v100_v4 = vmul.f32 %v76_v25, %v66_v34 }
  0x85   :  { %2362 = vtanh.f32 %v134_v58  ;;  %v89_v5 = vmul.f32 %v73_v22, %v62_v35  ;;  %v90_v10 = vmul.f32 %v74_v23, %v62_v35  ;;  %v113_v11 = vadd.f32 %v97_v1, %v56_v36 }
  0x86   :  { %2364 = vtanh.f32 %v135_v61  ;;  %v114_v12 = vadd.f32 %v98_v2, %v57_v37  ;;  %v115_v13 = vadd.f32 %v99_v3, %v58_v38  ;;  %v128_v14 = vadd.f32 %v2771_v52, %v104_v60  ;;  %v2207_v60 = vld [vmem:[%s3074_s1 + $0x20] sm:$0xff] }
  0x87   :  { %2366 = vtanh.f32 %v136_v62  ;;  %v116_v15 = vadd.f32 %v100_v4, %v59_v39  ;;  %v137_v18 = vadd.f32 %v2743_v9, %v113_v11  ;;  %v105_v19 = vadd.f32 %v89_v5, %v48_v56  ;;  %v2208_v5 = vld [vmem:[%s3074_s1 + $0x28] sm:$0xff] }
  0x88   :  { %2368 = vtanh.f32 %v125_v59  ;;  %v50_v22 = vmul.f32 %v34_v20, %v2731_v6  ;;  %v138_v23 = vadd.f32 %v2743_v9, %v114_v12  ;;  %v106_v26 = vadd.f32 %v90_v10, %v49_v16 }
  0x89   :  { %2370 = vtanh.f32 %v126_v63  ;;  %v51_v27 = vmul.f32 %v35_v21, %v2731_v6  ;;  %v139_v17 = vadd.f32 %v2743_v9, %v115_v13  ;;  %v91_v29 = vmul.f32 %v75_v24, %v62_v35 }
  0x8a   :  { %v2361_v28 = vpop.eup %2360  ;;  %2372 = vtanh.f32 %v127_v0  ;;  %v92_v30 = vmul.f32 %v76_v25, %v62_v35  ;;  %v140_v20 = vadd.f32 %v2743_v9, %v116_v15  ;;  %v129_v6 = vadd.f32 %v2771_v52, %v105_v19  ;;  %v2189_v9 = vld [vmem:[%s3074_s1 + $0x10] sm:$0xff] }
  0x8b   :  { %v2363_v31 = vpop.eup %2362  ;;  %181 = vmatpush.msra.mxu0 %v2361_v28  ;;  %2374 = vtanh.f32 %v128_v14  ;;  %v107_v7 = vadd.f32 %v91_v29, %v50_v22  ;;  %v130_v24 = vadd.f32 %v2771_v52, %v106_v26 }
  0x8c   :  { %v2365_v32 = vpop.eup %2364  ;;  %204 = vmatpush.msra.mxu1 %v2363_v31  ;;  %2376 = vtanh.f32 %v137_v18  ;;  %v108_v21 = vadd.f32 %v92_v30, %v51_v27 }
  0x8d   :  { %v2367_v33 = vpop.eup %2366  ;;  %227 = vmatpush.msra.mxu2 %v2365_v32  ;;  %2378 = vtanh.f32 %v138_v23  ;;  %v131_v8 = vadd.f32 %v2771_v52, %v107_v7 }
  0x8e   :  { %v2369_v34 = vpop.eup %2368  ;;  %250 = vmatpush.msra.mxu3 %v2367_v33  ;;  %2380 = vtanh.f32 %v139_v17  ;;  %v132_v35 = vadd.f32 %v2771_v52, %v108_v21 }
  0x8f   :  { %v2371_v25 = vpop.eup %2370  ;;  %182 = vmatpush.msra.mxu0 %v2369_v34  ;;  %2382 = vtanh.f32 %v140_v20 }
  0x90   :  { %v2373_v36 = vpop.eup %2372  ;;  %205 = vmatpush.msra.mxu1 %v2371_v25  ;;  %2384 = vtanh.f32 %v129_v6  ;;  %2191 = vmatmul.msk.f32.vlgmr.msra.gmra.mxu0 %vm160_vm0, %v2189_v9  ;;  %v2225_v25 = vld [vmem:[%s3074_s1 + $0x30] sm:$0xff] }
  0x91   :  { %v2375_v37 = vpop.eup %2374  ;;  %228 = vmatpush.msra.mxu2 %v2373_v36  ;;  %2386 = vtanh.f32 %v130_v24  ;;  %2193 = vmatmul.msk.f32.vlgmr.msra.gmra.mxu1 %vm160_vm0, %v2189_v9 }
  0x92   :  { %v2377_v38 = vpop.eup %2376  ;;  %251 = vmatpush.msra.mxu3 %v2375_v37  ;;  %2195 = vmatmul.msk.f32.vlgmr.msra.gmra.mxu2 %vm160_vm0, %v2189_v9  ;;  %2388 = vtanh.f32 %v131_v8 }
  0x93   :  { %v2379_v39 = vpop.eup %2378  ;;  %2197 = vmatmul.msk.f32.vlgmr.msra.gmra.mxu3 %vm160_vm0, %v2189_v9  ;;  %273 = vmatpush.msrb.mxu0 %v2377_v38  ;;  %2390 = vtanh.f32 %v132_v35 }
  0x94   :  { %v2381_v40 = vpop.eup %2380  ;;  %296 = vmatpush.msrb.mxu1 %v2379_v39 }
  0x95   :  { %v2383_v41 = vpop.eup %2382  ;;  %319 = vmatpush.msrb.mxu2 %v2381_v40  ;;  %v2226_v40 = vld [vmem:[%s3074_s1 + $0x38] sm:$0xff] }
  0x96   :  { %v2385_v42 = vpop.eup %2384  ;;  %342 = vmatpush.msrb.mxu3 %v2383_v41 }
  0x97   :  { %v2387_v43 = vpop.eup %2386  ;;  %274 = vmatpush.msrb.mxu0 %v2385_v42 }
  0x98   :  { %v2389_v45 = vpop.eup %2388  ;;  %297 = vmatpush.msrb.mxu1 %v2387_v43  ;;  %2192 = vmatmul.msk.f32.gmra.mxu0 %vm160_vm0, %v2190_v44 }
  0x99   :  { %v2391_v46 = vpop.eup %2390  ;;  %320 = vmatpush.msrb.mxu2 %v2389_v45  ;;  %2194 = vmatmul.msk.f32.gmra.mxu1 %vm160_vm0, %v2190_v44 }
  0x9a   :  { %343 = vmatpush.msrb.mxu3 %v2391_v46  ;;  %2196 = vmatmul.msk.f32.gmra.mxu2 %vm160_vm0, %v2190_v44 }
  0x9b   :  { %2198 = vmatmul.msk.f32.gmra.mxu3 %vm160_vm0, %v2190_v44 }
  0xa0   :  { %2199 = vmatmul.msk.f32.vlgmr.msrb.gmra.mxu0 %vm160_vm0, %v2189_v9 }
  0xa1   :  { %2201 = vmatmul.msk.f32.vlgmr.msrb.gmra.mxu1 %vm160_vm0, %v2189_v9 }
  0xa2   :  { %2203 = vmatmul.msk.f32.vlgmr.msrb.gmra.mxu2 %vm160_vm0, %v2189_v9 }
  0xa3   :  { %2205 = vmatmul.msk.f32.vlgmr.msrb.gmra.mxu3 %vm160_vm0, %v2189_v9 }
  0xa8   :  { %2200 = vmatmul.msk.f32.gmra.mxu0 %vm160_vm0, %v2190_v44 }
  0xa9   :  { %2202 = vmatmul.msk.f32.gmra.mxu1 %vm160_vm0, %v2190_v44 }
  0xaa   :  { %2204 = vmatmul.msk.f32.gmra.mxu2 %vm160_vm0, %v2190_v44 }
  0xab   :  { %2206 = vmatmul.msk.f32.gmra.mxu3 %vm160_vm0, %v2190_v44 }
 0x10d   :  { %v184_v50 = vpop.f32.mrf.mxu0 }
 0x10e   :  { %v207_v49 = vpop.f32.mrf.mxu1 }
 0x115   :  { %v230_v47 = vpop.f32.mrf.mxu2  ;;  %v187_v54 = vpop.f32.mrf.mxu0 }
 0x116   :  { %v253_v48 = vpop.f32.mrf.mxu3  ;;  %2392 = vtanh.f32 %v230_v47  ;;  %v210_v53 = vpop.f32.mrf.mxu1 }
 0x117   :  { %2394 = vtanh.f32 %v253_v48 }
 0x11c   :  { %v2393_v55 = vpop.eup %2392 }
 0x11d   :  { %v233_v51 = vpop.f32.mrf.mxu2  ;;  %v2395_v56 = vpop.eup %2394 }
 0x11e   :  { %2396 = vtanh.f32 %v233_v51  ;;  %v256_v52 = vpop.f32.mrf.mxu3  ;;  %v299_v2 = vpop.f32.mrf.mxu1 }
 0x11f   :  { %2398 = vtanh.f32 %v256_v52  ;;  %v276_v3 = vpop.f32.mrf.mxu0 }
 0x120   :  { %2400 = vtanh.f32 %v207_v49 }
 0x121   :  { %2402 = vtanh.f32 %v184_v50 }
 0x122   :  { %2404 = vtanh.f32 %v210_v53 }
 0x123   :  { %2406 = vtanh.f32 %v187_v54 }
 0x124   :  { %v2397_v57 = vpop.eup %2396 }
 0x125   :  { %v2399_v58 = vpop.eup %2398  ;;  %v322_v59 = vpop.f32.mrf.mxu2  ;;  %436 = vmatpush.msra.mxu2 %v2397_v57 }
 0x126   :  { %v2401_v61 = vpop.eup %2400  ;;  %v345_v62 = vpop.f32.mrf.mxu3  ;;  %459 = vmatpush.msra.mxu3 %v2399_v58  ;;  %2408 = vtanh.f32 %v322_v59 }
 0x127   :  { %v2403_v63 = vpop.eup %2402  ;;  %437 = vmatpush.msra.mxu2 %v2393_v55  ;;  %2410 = vtanh.f32 %v345_v62  ;;  %v302_v11 = vpop.f32.mrf.mxu1 }
 0x128   :  { %v2405_v0 = vpop.eup %2404  ;;  %460 = vmatpush.msra.mxu3 %v2395_v56  ;;  %2213 = vmatmul.msk.f32.vlgmr.msra.gmra.mxu2 %vm160_vm0, %v2207_v60  ;;  %v279_v12 = vpop.f32.mrf.mxu0 }
 0x129   :  { %v2407_v1 = vpop.eup %2406  ;;  %2215 = vmatmul.msk.f32.vlgmr.msra.gmra.mxu3 %vm160_vm0, %v2207_v60  ;;  %413 = vmatpush.msra.mxu1 %v2405_v0  ;;  %v2243_v0 = vld [vmem:[%s3074_s1 + $0x40] sm:$0xff] }
 0x12a   :  { %390 = vmatpush.msra.mxu0 %v2407_v1 }
 0x12b   :  { %414 = vmatpush.msra.mxu1 %v2401_v61 }
 0x12c   :  { %2211 = vmatmul.msk.f32.vlgmr.msra.gmra.mxu1 %vm160_vm0, %v2207_v60  ;;  %391 = vmatpush.msra.mxu0 %v2403_v63  ;;  %v2409_v13 = vpop.eup %2408 }
 0x12d   :  { %v325_v4 = vpop.f32.mrf.mxu2  ;;  %2209 = vmatmul.msk.f32.vlgmr.msra.gmra.mxu0 %vm160_vm0, %v2207_v60  ;;  %v2411_v14 = vpop.eup %2410 }
 0x12e   :  { %2412 = vtanh.f32 %v325_v4  ;;  %v348_v10 = vpop.f32.mrf.mxu3 }
 0x12f   :  { %2414 = vtanh.f32 %v348_v10 }
 0x130   :  { %2214 = vmatmul.msk.f32.gmra.mxu2 %vm160_vm0, %v2208_v5  ;;  %2416 = vtanh.f32 %v299_v2 }
 0x131   :  { %2216 = vmatmul.msk.f32.gmra.mxu3 %vm160_vm0, %v2208_v5  ;;  %2418 = vtanh.f32 %v276_v3 }
 0x132   :  { %2420 = vtanh.f32 %v302_v11 }
 0x133   :  { %2422 = vtanh.f32 %v279_v12 }
 0x134   :  { %v2413_v15 = vpop.eup %2412  ;;  %2212 = vmatmul.msk.f32.gmra.mxu1 %vm160_vm0, %v2208_v5 }
 0x135   :  { %v2415_v16 = vpop.eup %2414  ;;  %528 = vmatpush.msrb.mxu2 %v2413_v15  ;;  %2210 = vmatmul.msk.f32.gmra.mxu0 %vm160_vm0, %v2208_v5 }
 0x136   :  { %v2417_v18 = vpop.eup %2416  ;;  %551 = vmatpush.msrb.mxu3 %v2415_v16 }
 0x137   :  { %v2419_v19 = vpop.eup %2418  ;;  %529 = vmatpush.msrb.mxu2 %v2409_v13  ;;  %v2244_v13 = vld [vmem:[%s3074_s1 + $0x48] sm:$0xff] }
 0x138   :  { %v2421_v22 = vpop.eup %2420  ;;  %552 = vmatpush.msrb.mxu3 %v2411_v14  ;;  %2221 = vmatmul.msk.f32.vlgmr.msrb.gmra.mxu2 %vm160_vm0, %v2207_v60 }
 0x139   :  { %v2423_v23 = vpop.eup %2422  ;;  %2223 = vmatmul.msk.f32.vlgmr.msrb.gmra.mxu3 %vm160_vm0, %v2207_v60  ;;  %505 = vmatpush.msrb.mxu1 %v2421_v22 }
 0x13a   :  { %482 = vmatpush.msrb.mxu0 %v2423_v23 }
 0x13b   :  { %506 = vmatpush.msrb.mxu1 %v2417_v18 }
 0x13c   :  { %2219 = vmatmul.msk.f32.vlgmr.msrb.gmra.mxu1 %vm160_vm0, %v2207_v60  ;;  %483 = vmatpush.msrb.mxu0 %v2419_v19 }
 0x13d   :  { %2217 = vmatmul.msk.f32.vlgmr.msrb.gmra.mxu0 %vm160_vm0, %v2207_v60 }
 0x140   :  { %2222 = vmatmul.msk.f32.gmra.mxu2 %vm160_vm0, %v2208_v5 }
 0x141   :  { %2224 = vmatmul.msk.f32.gmra.mxu3 %vm160_vm0, %v2208_v5 }
 0x144   :  { %2220 = vmatmul.msk.f32.gmra.mxu1 %vm160_vm0, %v2208_v5 }
 0x145   :  { %2218 = vmatmul.msk.f32.gmra.mxu0 %vm160_vm0, %v2208_v5 }
 0x1a9   :  { %v416_v26 = vpop.f32.mrf.mxu1 }
 0x1aa   :  { %v393_v17 = vpop.f32.mrf.mxu0  ;;  %2424 = vtanh.f32 %v416_v26 }
 0x1ab   :  { %v439_v27 = vpop.f32.mrf.mxu2 }
 0x1ac   :  { %v462_v28 = vpop.f32.mrf.mxu3  ;;  %2426 = vtanh.f32 %v439_v27 }
 0x1b0   :  { %v2425_v32 = vpop.eup %2424 }
 0x1b1   :  { %v419_v29 = vpop.f32.mrf.mxu1 }
 0x1b2   :  { %2428 = vtanh.f32 %v419_v29  ;;  %v396_v20 = vpop.f32.mrf.mxu0  ;;  %v2427_v6 = vpop.eup %2426 }
 0x1b3   :  { %v442_v30 = vpop.f32.mrf.mxu2  ;;  %2430 = vtanh.f32 %v393_v17 }
 0x1b4   :  { %2432 = vtanh.f32 %v442_v30  ;;  %v465_v31 = vpop.f32.mrf.mxu3 }
 0x1b5   :  { %2434 = vtanh.f32 %v465_v31 }
 0x1b6   :  { %2436 = vtanh.f32 %v396_v20 }
 0x1b7   :  { %2438 = vtanh.f32 %v462_v28 }
 0x1b8   :  { %v2429_v7 = vpop.eup %2428 }
 0x1b9   :  { %v2431_v21 = vpop.eup %2430  ;;  %v508_v33 = vpop.f32.mrf.mxu1  ;;  %622 = vmatpush.msra.mxu1 %v2429_v7 }
 0x1ba   :  { %v2433_v24 = vpop.eup %2432  ;;  %v485_v36 = vpop.f32.mrf.mxu0  ;;  %2440 = vtanh.f32 %v508_v33 }
 0x1bb   :  { %v2435_v34 = vpop.eup %2434  ;;  %v531_v8 = vpop.f32.mrf.mxu2  ;;  %645 = vmatpush.msra.mxu2 %v2433_v24  ;;  %623 = vmatpush.msra.mxu1 %v2425_v32 }
 0x1bc   :  { %v2437_v9 = vpop.eup %2436  ;;  %v554_v35 = vpop.f32.mrf.mxu3  ;;  %668 = vmatpush.msra.mxu3 %v2435_v34  ;;  %2229 = vmatmul.msk.f32.vlgmr.msra.gmra.mxu1 %vm160_vm0, %v2225_v25  ;;  %2442 = vtanh.f32 %v531_v8  ;;  %v2898_v8 = vld [vmem:[%s3074_s1 + $0x50] sm:$0xff] }
 0x1bd   :  { %v2439_v37 = vpop.eup %2438  ;;  %646 = vmatpush.msra.mxu2 %v2427_v6  ;;  %599 = vmatpush.msra.mxu0 %v2437_v9 }
 0x1be   :  { %669 = vmatpush.msra.mxu3 %v2439_v37  ;;  %2231 = vmatmul.msk.f32.vlgmr.msra.gmra.mxu2 %vm160_vm0, %v2225_v25 }
 0x1bf   :  { %2233 = vmatmul.msk.f32.vlgmr.msra.gmra.mxu3 %vm160_vm0, %v2225_v25  ;;  %600 = vmatpush.msra.mxu0 %v2431_v21 }
 0x1c0   :  { %2227 = vmatmul.msk.f32.vlgmr.msra.gmra.mxu0 %vm160_vm0, %v2225_v25  ;;  %v2441_v43 = vpop.eup %2440 }
 0x1c1   :  { %v511_v38 = vpop.f32.mrf.mxu1 }
 0x1c2   :  { %2444 = vtanh.f32 %v511_v38  ;;  %v488_v42 = vpop.f32.mrf.mxu0  ;;  %v2443_v44 = vpop.eup %2442  ;;  %v2262_v38 = vld [vmem:[%s3074_s1 + $0x58] sm:$0xff] }
 0x1c3   :  { %v534_v39 = vpop.f32.mrf.mxu2  ;;  %2446 = vtanh.f32 %v485_v36 }
 0x1c4   :  { %2448 = vtanh.f32 %v534_v39  ;;  %v557_v41 = vpop.f32.mrf.mxu3  ;;  %2230 = vmatmul.msk.f32.gmra.mxu1 %vm160_vm0, %v2226_v40 }
 0x1c5   :  { %2450 = vtanh.f32 %v557_v41 }
 0x1c6   :  { %2232 = vmatmul.msk.f32.gmra.mxu2 %vm160_vm0, %v2226_v40  ;;  %2452 = vtanh.f32 %v488_v42 }
 0x1c7   :  { %2454 = vtanh.f32 %v554_v35  ;;  %2234 = vmatmul.msk.f32.gmra.mxu3 %vm160_vm0, %v2226_v40 }
 0x1c8   :  { %v2445_v45 = vpop.eup %2444  ;;  %2228 = vmatmul.msk.f32.gmra.mxu0 %vm160_vm0, %v2226_v40 }
 0x1c9   :  { %v2447_v46 = vpop.eup %2446  ;;  %714 = vmatpush.msrb.mxu1 %v2445_v45 }
 0x1ca   :  { %v2449_v47 = vpop.eup %2448 }
 0x1cb   :  { %v2451_v48 = vpop.eup %2450  ;;  %737 = vmatpush.msrb.mxu2 %v2449_v47  ;;  %715 = vmatpush.msrb.mxu1 %v2441_v43 }
 0x1cc   :  { %v2453_v49 = vpop.eup %2452  ;;  %760 = vmatpush.msrb.mxu3 %v2451_v48  ;;  %2237 = vmatmul.msk.f32.vlgmr.msrb.gmra.mxu1 %vm160_vm0, %v2225_v25 }
 0x1cd   :  { %v2455_v50 = vpop.eup %2454  ;;  %738 = vmatpush.msrb.mxu2 %v2443_v44  ;;  %691 = vmatpush.msrb.mxu0 %v2453_v49 }
 0x1ce   :  { %761 = vmatpush.msrb.mxu3 %v2455_v50  ;;  %2239 = vmatmul.msk.f32.vlgmr.msrb.gmra.mxu2 %vm160_vm0, %v2225_v25 }
 0x1cf   :  { %2241 = vmatmul.msk.f32.vlgmr.msrb.gmra.mxu3 %vm160_vm0, %v2225_v25  ;;  %692 = vmatpush.msrb.mxu0 %v2447_v46 }
 0x1d0   :  { %2235 = vmatmul.msk.f32.vlgmr.msrb.gmra.mxu0 %vm160_vm0, %v2225_v25 }
 0x1d4   :  { %2238 = vmatmul.msk.f32.gmra.mxu1 %vm160_vm0, %v2226_v40 }
 0x1d6   :  { %2240 = vmatmul.msk.f32.gmra.mxu2 %vm160_vm0, %v2226_v40 }
 0x1d7   :  { %2242 = vmatmul.msk.f32.gmra.mxu3 %vm160_vm0, %v2226_v40 }
 0x1d8   :  { %2236 = vmatmul.msk.f32.gmra.mxu0 %vm160_vm0, %v2226_v40 }
 0x239   :  { %v625_v51 = vpop.f32.mrf.mxu1 }
 0x23a   :  { %2456 = vtanh.f32 %v625_v51 }
 0x23d   :  { %v602_v52 = vpop.f32.mrf.mxu0 }
 0x240   :  { %v2457_v57 = vpop.eup %2456 }
 0x241   :  { %v648_v53 = vpop.f32.mrf.mxu2  ;;  %v628_v55 = vpop.f32.mrf.mxu1 }
 0x242   :  { %v671_v54 = vpop.f32.mrf.mxu3  ;;  %2458 = vtanh.f32 %v628_v55 }
 0x243   :  { %2460 = vtanh.f32 %v602_v52 }
 0x245   :  { %v605_v56 = vpop.f32.mrf.mxu0 }
 0x246   :  { %2462 = vtanh.f32 %v605_v56 }
 0x248   :  { %v2459_v59 = vpop.eup %2458 }
 0x249   :  { %v651_v58 = vpop.f32.mrf.mxu2  ;;  %v2461_v61 = vpop.eup %2460  ;;  %831 = vmatpush.msra.mxu1 %v2459_v59 }
 0x24a   :  { %2464 = vtanh.f32 %v651_v58  ;;  %v674_v60 = vpop.f32.mrf.mxu3  ;;  %v717_v62 = vpop.f32.mrf.mxu1 }
 0x24b   :  { %2466 = vtanh.f32 %v674_v60  ;;  %832 = vmatpush.msra.mxu1 %v2457_v57 }
 0x24c   :  { %v2463_v63 = vpop.eup %2462  ;;  %2468 = vtanh.f32 %v648_v53  ;;  %2247 = vmatmul.msk.f32.vlgmr.msra.gmra.mxu1 %vm160_vm0, %v2243_v0 }
 0x24d   :  { %2470 = vtanh.f32 %v671_v54  ;;  %v694_v1 = vpop.f32.mrf.mxu0  ;;  %808 = vmatpush.msra.mxu0 %v2463_v63 }
 0x24e   :  { %2472 = vtanh.f32 %v717_v62 }
 0x24f   :  { %809 = vmatpush.msra.mxu0 %v2461_v61 }
 0x250   :  { %v2465_v2 = vpop.eup %2464  ;;  %2245 = vmatmul.msk.f32.vlgmr.msra.gmra.mxu0 %vm160_vm0, %v2243_v0 }
 0x251   :  { %v2467_v3 = vpop.eup %2466  ;;  %v740_v4 = vpop.f32.mrf.mxu2  ;;  %854 = vmatpush.msra.mxu2 %v2465_v2 }
 0x252   :  { %v2469_v5 = vpop.eup %2468  ;;  %v763_v10 = vpop.f32.mrf.mxu3  ;;  %877 = vmatpush.msra.mxu3 %v2467_v3 }
 0x253   :  { %v2471_v11 = vpop.eup %2470  ;;  %855 = vmatpush.msra.mxu2 %v2469_v5  ;;  %v720_v12 = vpop.f32.mrf.mxu1 }
 0x254   :  { %878 = vmatpush.msra.mxu3 %v2471_v11  ;;  %2249 = vmatmul.msk.f32.vlgmr.msra.gmra.mxu2 %vm160_vm0, %v2243_v0  ;;  %2474 = vtanh.f32 %v720_v12  ;;  %v2473_v15 = vpop.eup %2472 }
 0x255   :  { %2251 = vmatmul.msk.f32.vlgmr.msra.gmra.mxu3 %vm160_vm0, %v2243_v0  ;;  %2476 = vtanh.f32 %v694_v1  ;;  %v697_v14 = vpop.f32.mrf.mxu0  ;;  %2248 = vmatmul.msk.f32.gmra.mxu1 %vm160_vm0, %v2244_v13  ;;  %v2930_v1 = vld [vmem:[%s3074_s1 + $0x60] sm:$0xff] }
 0x256   :  { %2478 = vtanh.f32 %v697_v14 }
 0x258   :  { %2246 = vmatmul.msk.f32.gmra.mxu0 %vm160_vm0, %v2244_v13 }
 0x259   :  { %v743_v16 = vpop.f32.mrf.mxu2 }
 0x25a   :  { %v2475_v18 = vpop.eup %2474  ;;  %2480 = vtanh.f32 %v743_v16  ;;  %v766_v19 = vpop.f32.mrf.mxu3 }
 0x25b   :  { %v2477_v22 = vpop.eup %2476  ;;  %2482 = vtanh.f32 %v766_v19  ;;  %923 = vmatpush.msrb.mxu1 %v2475_v18 }
 0x25c   :  { %v2479_v23 = vpop.eup %2478  ;;  %2484 = vtanh.f32 %v740_v4  ;;  %2250 = vmatmul.msk.f32.gmra.mxu2 %vm160_vm0, %v2244_v13 }
 0x25d   :  { %2486 = vtanh.f32 %v763_v10  ;;  %2252 = vmatmul.msk.f32.gmra.mxu3 %vm160_vm0, %v2244_v13  ;;  %900 = vmatpush.msrb.mxu0 %v2479_v23  ;;  %v2280_v10 = vld [vmem:[%s3074_s1 + $0x68] sm:$0xff] }
 0x25e   :  { %924 = vmatpush.msrb.mxu1 %v2473_v15 }
 0x25f   :  { %2255 = vmatmul.msk.f32.vlgmr.msrb.gmra.mxu1 %vm160_vm0, %v2243_v0  ;;  %901 = vmatpush.msrb.mxu0 %v2477_v22 }
 0x260   :  { %v2481_v26 = vpop.eup %2480  ;;  %2253 = vmatmul.msk.f32.vlgmr.msrb.gmra.mxu0 %vm160_vm0, %v2243_v0 }
 0x261   :  { %v2483_v27 = vpop.eup %2482  ;;  %946 = vmatpush.msrb.mxu2 %v2481_v26 }
 0x262   :  { %v2485_v28 = vpop.eup %2484  ;;  %969 = vmatpush.msrb.mxu3 %v2483_v27 }
 0x263   :  { %v2487_v17 = vpop.eup %2486  ;;  %947 = vmatpush.msrb.mxu2 %v2485_v28 }
 0x264   :  { %970 = vmatpush.msrb.mxu3 %v2487_v17  ;;  %2257 = vmatmul.msk.f32.vlgmr.msrb.gmra.mxu2 %vm160_vm0, %v2243_v0 }
 0x265   :  { %2259 = vmatmul.msk.f32.vlgmr.msrb.gmra.mxu3 %vm160_vm0, %v2243_v0 }
 0x267   :  { %2256 = vmatmul.msk.f32.gmra.mxu1 %vm160_vm0, %v2244_v13 }
 0x268   :  { %2254 = vmatmul.msk.f32.gmra.mxu0 %vm160_vm0, %v2244_v13 }
 0x26c   :  { %2258 = vmatmul.msk.f32.gmra.mxu2 %vm160_vm0, %v2244_v13 }
 0x26d   :  { %2260 = vmatmul.msk.f32.gmra.mxu3 %vm160_vm0, %v2244_v13 }
 0x2c9   :  { %v834_v29 = vpop.f32.mrf.mxu1 }
 0x2ca   :  { %2488 = vtanh.f32 %v834_v29 }
 0x2cd   :  { %v811_v30 = vpop.f32.mrf.mxu0 }
 0x2d0   :  { %v2489_v7 = vpop.eup %2488 }
 0x2d2   :  { %v837_v31 = vpop.f32.mrf.mxu1 }
 0x2d3   :  { %2490 = vtanh.f32 %v837_v31 }
 0x2d4   :  { %2492 = vtanh.f32 %v811_v30 }
 0x2d5   :  { %v814_v20 = vpop.f32.mrf.mxu0 }
 0x2d6   :  { %2494 = vtanh.f32 %v814_v20 }
 0x2d7   :  { %v857_v32 = vpop.f32.mrf.mxu2 }
 0x2d8   :  { %v880_v6 = vpop.f32.mrf.mxu3  ;;  %2496 = vtanh.f32 %v857_v32 }
 0x2d9   :  { %v2491_v21 = vpop.eup %2490 }
 0x2da   :  { %v2493_v33 = vpop.eup %2492  ;;  %1040 = vmatpush.msra.mxu1 %v2491_v21 }
 0x2dc   :  { %v2495_v24 = vpop.eup %2494  ;;  %v926_v34 = vpop.f32.mrf.mxu1  ;;  %1041 = vmatpush.msra.mxu1 %v2489_v7 }
 0x2dd   :  { %v903_v25 = vpop.f32.mrf.mxu0  ;;  %1017 = vmatpush.msra.mxu0 %v2495_v24  ;;  %2265 = vmatmul.msk.f32.vlgmr.msra.gmra.mxu1 %vm160_vm0, %v2898_v8 }
 0x2de   :  { %v2497_v37 = vpop.eup %2496 }
 0x2df   :  { %v860_v9 = vpop.f32.mrf.mxu2  ;;  %1018 = vmatpush.msra.mxu0 %v2493_v33 }
 0x2e0   :  { %2498 = vtanh.f32 %v860_v9  ;;  %v883_v35 = vpop.f32.mrf.mxu3  ;;  %2263 = vmatmul.msk.f32.vlgmr.msra.gmra.mxu0 %vm160_vm0, %v2898_v8 }
 0x2e1   :  { %2500 = vtanh.f32 %v883_v35 }
 0x2e2   :  { %2502 = vtanh.f32 %v880_v6 }
 0x2e3   :  { %2504 = vtanh.f32 %v926_v34 }
 0x2e4   :  { %2506 = vtanh.f32 %v903_v25  ;;  %v929_v36 = vpop.f32.mrf.mxu1  ;;  %v2962_v25 = vld [vmem:[%s3074_s1 + $0x70] sm:$0xff] }
 0x2e5   :  { %2508 = vtanh.f32 %v929_v36  ;;  %v906_v39 = vpop.f32.mrf.mxu0  ;;  %2266 = vmatmul.msk.f32.gmra.mxu1 %vm160_vm0, %v2262_v38 }
 0x2e6   :  { %v2499_v40 = vpop.eup %2498  ;;  %2510 = vtanh.f32 %v906_v39 }
 0x2e7   :  { %v2501_v41 = vpop.eup %2500  ;;  %v949_v42 = vpop.f32.mrf.mxu2  ;;  %1063 = vmatpush.msra.mxu2 %v2499_v40 }
 0x2e8   :  { %v2503_v43 = vpop.eup %2502  ;;  %v972_v44 = vpop.f32.mrf.mxu3  ;;  %1086 = vmatpush.msra.mxu3 %v2501_v41  ;;  %2264 = vmatmul.msk.f32.gmra.mxu0 %vm160_vm0, %v2262_v38 }
 0x2e9   :  { %v2505_v45 = vpop.eup %2504  ;;  %1064 = vmatpush.msra.mxu2 %v2497_v37 }
 0x2ea   :  { %v2507_v46 = vpop.eup %2506  ;;  %1087 = vmatpush.msra.mxu3 %v2503_v43  ;;  %2267 = vmatmul.msk.f32.vlgmr.msra.gmra.mxu2 %vm160_vm0, %v2898_v8 }
 0x2eb   :  { %v2509_v47 = vpop.eup %2508  ;;  %2269 = vmatmul.msk.f32.vlgmr.msra.gmra.mxu3 %vm160_vm0, %v2898_v8 }
 0x2ec   :  { %v2511_v48 = vpop.eup %2510  ;;  %1132 = vmatpush.msrb.mxu1 %v2509_v47 }
 0x2ed   :  { %1109 = vmatpush.msrb.mxu0 %v2511_v48 }
 0x2ee   :  { %1133 = vmatpush.msrb.mxu1 %v2505_v45 }
 0x2ef   :  { %v952_v49 = vpop.f32.mrf.mxu2  ;;  %2273 = vmatmul.msk.f32.vlgmr.msrb.gmra.mxu1 %vm160_vm0, %v2898_v8  ;;  %1110 = vmatpush.msrb.mxu0 %v2507_v46 }
 0x2f0   :  { %2512 = vtanh.f32 %v952_v49  ;;  %v975_v50 = vpop.f32.mrf.mxu3  ;;  %2271 = vmatmul.msk.f32.vlgmr.msrb.gmra.mxu0 %vm160_vm0, %v2898_v8 }
 0x2f1   :  { %2514 = vtanh.f32 %v975_v50 }
 0x2f2   :  { %2516 = vtanh.f32 %v949_v42  ;;  %2268 = vmatmul.msk.f32.gmra.mxu2 %vm160_vm0, %v2262_v38 }
 0x2f3   :  { %2518 = vtanh.f32 %v972_v44  ;;  %2270 = vmatmul.msk.f32.gmra.mxu3 %vm160_vm0, %v2262_v38 }
 0x2f6   :  { %v2513_v51 = vpop.eup %2512 }
 0x2f7   :  { %v2515_v52 = vpop.eup %2514  ;;  %1155 = vmatpush.msrb.mxu2 %v2513_v51  ;;  %2274 = vmatmul.msk.f32.gmra.mxu1 %vm160_vm0, %v2262_v38 }
 0x2f8   :  { %v2517_v53 = vpop.eup %2516  ;;  %1178 = vmatpush.msrb.mxu3 %v2515_v52  ;;  %2272 = vmatmul.msk.f32.gmra.mxu0 %vm160_vm0, %v2262_v38 }
 0x2f9   :  { %v2519_v54 = vpop.eup %2518  ;;  %1156 = vmatpush.msrb.mxu2 %v2517_v53 }
 0x2fa   :  { %1179 = vmatpush.msrb.mxu3 %v2519_v54  ;;  %2275 = vmatmul.msk.f32.vlgmr.msrb.gmra.mxu2 %vm160_vm0, %v2898_v8 }
 0x2fb   :  { %2277 = vmatmul.msk.f32.vlgmr.msrb.gmra.mxu3 %vm160_vm0, %v2898_v8 }
 0x302   :  { %2276 = vmatmul.msk.f32.gmra.mxu2 %vm160_vm0, %v2262_v38 }
 0x303   :  { %2278 = vmatmul.msk.f32.gmra.mxu3 %vm160_vm0, %v2262_v38  ;;  %v2298_v38 = vld [vmem:[%s3074_s1 + $0x78] sm:$0xff] }
 0x35a   :  { %v1043_v55 = vpop.f32.mrf.mxu1 }
 0x35b   :  { %2520 = vtanh.f32 %v1043_v55 }
 0x35d   :  { %v1020_v56 = vpop.f32.mrf.mxu0 }
 0x361   :  { %v2521_v59 = vpop.eup %2520 }
 0x362   :  { %v1046_v57 = vpop.f32.mrf.mxu1 }
 0x363   :  { %2522 = vtanh.f32 %v1046_v57 }
 0x364   :  { %2524 = vtanh.f32 %v1020_v56 }
 0x365   :  { %v1023_v58 = vpop.f32.mrf.mxu0 }
 0x366   :  { %2526 = vtanh.f32 %v1023_v58 }
 0x369   :  { %v2523_v60 = vpop.eup %2522 }
 0x36a   :  { %v2525_v61 = vpop.eup %2524  ;;  %1249 = vmatpush.msra.mxu1 %v2523_v60 }
 0x36c   :  { %v2527_v62 = vpop.eup %2526  ;;  %v1135_v63 = vpop.f32.mrf.mxu1  ;;  %1250 = vmatpush.msra.mxu1 %v2521_v59 }
 0x36d   :  { %v1066_v0 = vpop.f32.mrf.mxu2  ;;  %v1112_v2 = vpop.f32.mrf.mxu0  ;;  %1226 = vmatpush.msra.mxu0 %v2527_v62  ;;  %2283 = vmatmul.msk.f32.vlgmr.msra.gmra.mxu1 %vm160_vm0, %v2930_v1  ;;  %2528 = vtanh.f32 %v1135_v63 }
 0x36e   :  { %v1089_v3 = vpop.f32.mrf.mxu3  ;;  %2530 = vtanh.f32 %v1066_v0 }
 0x36f   :  { %1227 = vmatpush.msra.mxu0 %v2525_v61  ;;  %2532 = vtanh.f32 %v1089_v3  ;;  %v2994_v3 = vld [vmem:[%s3074_s1 + $0x80] sm:$0xff] }
 0x370   :  { %2281 = vmatmul.msk.f32.vlgmr.msra.gmra.mxu0 %vm160_vm0, %v2930_v1 }
 0x373   :  { %v2529_v13 = vpop.eup %2528 }
 0x374   :  { %v1138_v4 = vpop.f32.mrf.mxu1  ;;  %v2531_v14 = vpop.eup %2530 }
 0x375   :  { %v1069_v5 = vpop.f32.mrf.mxu2  ;;  %2534 = vtanh.f32 %v1138_v4  ;;  %v1115_v11 = vpop.f32.mrf.mxu0  ;;  %2284 = vmatmul.msk.f32.gmra.mxu1 %vm160_vm0, %v2280_v10 }
 0x376   :  { %2536 = vtanh.f32 %v1069_v5  ;;  %v1092_v12 = vpop.f32.mrf.mxu3  ;;  %v2533_v15 = vpop.eup %2532 }
 0x377   :  { %2538 = vtanh.f32 %v1092_v12 }
 0x378   :  { %2540 = vtanh.f32 %v1115_v11  ;;  %2282 = vmatmul.msk.f32.gmra.mxu0 %vm160_vm0, %v2280_v10 }
 0x379   :  { %2542 = vtanh.f32 %v1112_v2 }
 0x37b   :  { %v2535_v16 = vpop.eup %2534 }
 0x37c   :  { %v2537_v18 = vpop.eup %2536  ;;  %1341 = vmatpush.msrb.mxu1 %v2535_v16 }
 0x37d   :  { %v2539_v19 = vpop.eup %2538  ;;  %v1158_v22 = vpop.f32.mrf.mxu2  ;;  %1272 = vmatpush.msra.mxu2 %v2537_v18 }
 0x37e   :  { %v2541_v23 = vpop.eup %2540  ;;  %v1181_v26 = vpop.f32.mrf.mxu3  ;;  %1295 = vmatpush.msra.mxu3 %v2539_v19  ;;  %1342 = vmatpush.msrb.mxu1 %v2529_v13 }
 0x37f   :  { %v2543_v27 = vpop.eup %2542  ;;  %1273 = vmatpush.msra.mxu2 %v2531_v14  ;;  %1318 = vmatpush.msrb.mxu0 %v2541_v23 }
 0x380   :  { %1296 = vmatpush.msra.mxu3 %v2533_v15  ;;  %2285 = vmatmul.msk.f32.vlgmr.msra.gmra.mxu2 %vm160_vm0, %v2930_v1 }
 0x381   :  { %2287 = vmatmul.msk.f32.vlgmr.msra.gmra.mxu3 %vm160_vm0, %v2930_v1  ;;  %2291 = vmatmul.msk.f32.vlgmr.msrb.gmra.mxu1 %vm160_vm0, %v2930_v1 }
 0x382   :  { %1319 = vmatpush.msrb.mxu0 %v2543_v27 }
 0x383   :  { %2289 = vmatmul.msk.f32.vlgmr.msrb.gmra.mxu0 %vm160_vm0, %v2930_v1 }
 0x385   :  { %v1161_v28 = vpop.f32.mrf.mxu2 }
 0x386   :  { %2544 = vtanh.f32 %v1161_v28  ;;  %v1184_v17 = vpop.f32.mrf.mxu3 }
 0x387   :  { %2546 = vtanh.f32 %v1184_v17 }
 0x388   :  { %2548 = vtanh.f32 %v1158_v22  ;;  %2286 = vmatmul.msk.f32.gmra.mxu2 %vm160_vm0, %v2280_v10 }
 0x389   :  { %2550 = vtanh.f32 %v1181_v26  ;;  %2288 = vmatmul.msk.f32.gmra.mxu3 %vm160_vm0, %v2280_v10  ;;  %2292 = vmatmul.msk.f32.gmra.mxu1 %vm160_vm0, %v2280_v10 }
 0x38b   :  { %2290 = vmatmul.msk.f32.gmra.mxu0 %vm160_vm0, %v2280_v10 }
 0x38c   :  { %v2545_v29 = vpop.eup %2544 }
 0x38d   :  { %v2547_v30 = vpop.eup %2546  ;;  %1364 = vmatpush.msrb.mxu2 %v2545_v29 }
 0x38e   :  { %v2549_v31 = vpop.eup %2548  ;;  %1387 = vmatpush.msrb.mxu3 %v2547_v30 }
 0x38f   :  { %v2551_v20 = vpop.eup %2550  ;;  %1365 = vmatpush.msrb.mxu2 %v2549_v31 }
 0x390   :  { %1388 = vmatpush.msrb.mxu3 %v2551_v20  ;;  %2293 = vmatmul.msk.f32.vlgmr.msrb.gmra.mxu2 %vm160_vm0, %v2930_v1 }
 0x391   :  { %2295 = vmatmul.msk.f32.vlgmr.msrb.gmra.mxu3 %vm160_vm0, %v2930_v1 }
 0x398   :  { %2294 = vmatmul.msk.f32.gmra.mxu2 %vm160_vm0, %v2280_v10 }
 0x399   :  { %2296 = vmatmul.msk.f32.gmra.mxu3 %vm160_vm0, %v2280_v10  ;;  %v2316_v10 = vld [vmem:[%s3074_s1 + $0x88] sm:$0xff] }
 0x3ea   :  { %v1252_v32 = vpop.f32.mrf.mxu1 }
 0x3eb   :  { %2552 = vtanh.f32 %v1252_v32 }
 0x3ed   :  { %v1229_v6 = vpop.f32.mrf.mxu0 }
 0x3f1   :  { %v2553_v33 = vpop.eup %2552 }
 0x3f2   :  { %v1255_v7 = vpop.f32.mrf.mxu1 }
 0x3f3   :  { %2554 = vtanh.f32 %v1255_v7 }
 0x3f4   :  { %2556 = vtanh.f32 %v1229_v6 }
 0x3f5   :  { %v1232_v21 = vpop.f32.mrf.mxu0 }
 0x3f6   :  { %2558 = vtanh.f32 %v1232_v21 }
 0x3f9   :  { %v2555_v24 = vpop.eup %2554 }
 0x3fa   :  { %v2557_v34 = vpop.eup %2556  ;;  %1458 = vmatpush.msra.mxu1 %v2555_v24 }
 0x3fc   :  { %v2559_v8 = vpop.eup %2558  ;;  %1459 = vmatpush.msra.mxu1 %v2553_v33 }
 0x3fd   :  { %1435 = vmatpush.msra.mxu0 %v2559_v8  ;;  %2301 = vmatmul.msk.f32.vlgmr.msra.gmra.mxu1 %vm160_vm0, %v2962_v25 }
 0x3fe   :  { %v1344_v9 = vpop.f32.mrf.mxu1 }
 0x3ff   :  { %1436 = vmatpush.msra.mxu0 %v2557_v34  ;;  %2560 = vtanh.f32 %v1344_v9 }
 0x400   :  { %v1321_v35 = vpop.f32.mrf.mxu0  ;;  %2299 = vmatmul.msk.f32.vlgmr.msra.gmra.mxu0 %vm160_vm0, %v2962_v25 }
 0x403   :  { %v1275_v36 = vpop.f32.mrf.mxu2 }
 0x404   :  { %v1298_v37 = vpop.f32.mrf.mxu3 }
 0x405   :  { %2302 = vmatmul.msk.f32.gmra.mxu1 %vm160_vm0, %v2298_v38  ;;  %v2561_v42 = vpop.eup %2560 }
 0x406   :  { %v1347_v39 = vpop.f32.mrf.mxu1 }
 0x407   :  { %2562 = vtanh.f32 %v1347_v39  ;;  %v2333_v39 = vld [vmem:[%s3074_s1 + $0x90] sm:$0xff]  ;;  %s2709_s1 = smov [#allocation2]  }
 0x408   :  { %2564 = vtanh.f32 %v1321_v35  ;;  %v1324_v40 = vpop.f32.mrf.mxu0  ;;  %2300 = vmatmul.msk.f32.gmra.mxu0 %vm160_vm0, %v2298_v38  ;;  %s2177_s21 = sshll.u32 %s2709_s1, 4  ;;  %s2178_s21 = int_to_ptr.vmem [resolvable:$true] %s2177_s21 }
 0x409   :  { %2566 = vtanh.f32 %v1324_v40 }
 0x40b   :  { %v1278_v41 = vpop.f32.mrf.mxu2 }
 0x40c   :  { %2568 = vtanh.f32 %v1278_v41  ;;  %v1301_v43 = vpop.f32.mrf.mxu3 }
 0x40d   :  { %v2563_v44 = vpop.eup %2562  ;;  %2570 = vtanh.f32 %v1301_v43 }
 0x40e   :  { %v2565_v45 = vpop.eup %2564  ;;  %2572 = vtanh.f32 %v1275_v36  ;;  %1550 = vmatpush.msrb.mxu1 %v2563_v44 }
 0x40f   :  { %v2567_v46 = vpop.eup %2566  ;;  %2574 = vtanh.f32 %v1298_v37 }
 0x410   :  { %1527 = vmatpush.msrb.mxu0 %v2567_v46  ;;  %1551 = vmatpush.msrb.mxu1 %v2561_v42 }
 0x411   :  { %2309 = vmatmul.msk.f32.vlgmr.msrb.gmra.mxu1 %vm160_vm0, %v2962_v25 }
 0x412   :  { %v2569_v47 = vpop.eup %2568  ;;  %1528 = vmatpush.msrb.mxu0 %v2565_v45 }
 0x413   :  { %v2571_v48 = vpop.eup %2570  ;;  %v1367_v49 = vpop.f32.mrf.mxu2  ;;  %1481 = vmatpush.msra.mxu2 %v2569_v47  ;;  %2307 = vmatmul.msk.f32.vlgmr.msrb.gmra.mxu0 %vm160_vm0, %v2962_v25 }
 0x414   :  { %v2573_v50 = vpop.eup %2572  ;;  %v1390_v51 = vpop.f32.mrf.mxu3  ;;  %1504 = vmatpush.msra.mxu3 %v2571_v48 }
 0x415   :  { %v2575_v52 = vpop.eup %2574  ;;  %1482 = vmatpush.msra.mxu2 %v2573_v50 }
 0x416   :  { %1505 = vmatpush.msra.mxu3 %v2575_v52  ;;  %2303 = vmatmul.msk.f32.vlgmr.msra.gmra.mxu2 %vm160_vm0, %v2962_v25 }
 0x417   :  { %2305 = vmatmul.msk.f32.vlgmr.msra.gmra.mxu3 %vm160_vm0, %v2962_v25 }
 0x419   :  { %2310 = vmatmul.msk.f32.gmra.mxu1 %vm160_vm0, %v2298_v38 }
 0x41b   :  { %v1370_v53 = vpop.f32.mrf.mxu2  ;;  %2308 = vmatmul.msk.f32.gmra.mxu0 %vm160_vm0, %v2298_v38 }
 0x41c   :  { %2576 = vtanh.f32 %v1370_v53  ;;  %v1393_v54 = vpop.f32.mrf.mxu3 }
 0x41d   :  { %2578 = vtanh.f32 %v1393_v54 }
 0x41e   :  { %2580 = vtanh.f32 %v1367_v49  ;;  %2304 = vmatmul.msk.f32.gmra.mxu2 %vm160_vm0, %v2298_v38 }
 0x41f   :  { %2582 = vtanh.f32 %v1390_v51  ;;  %2306 = vmatmul.msk.f32.gmra.mxu3 %vm160_vm0, %v2298_v38 }
 0x422   :  { %v2577_v55 = vpop.eup %2576 }
 0x423   :  { %v2579_v56 = vpop.eup %2578  ;;  %1573 = vmatpush.msrb.mxu2 %v2577_v55 }
 0x424   :  { %v2581_v57 = vpop.eup %2580  ;;  %1596 = vmatpush.msrb.mxu3 %v2579_v56 }
 0x425   :  { %v2583_v58 = vpop.eup %2582  ;;  %1574 = vmatpush.msrb.mxu2 %v2581_v57 }
 0x426   :  { %1597 = vmatpush.msrb.mxu3 %v2583_v58  ;;  %2311 = vmatmul.msk.f32.vlgmr.msrb.gmra.mxu2 %vm160_vm0, %v2962_v25 }
 0x427   :  { %2313 = vmatmul.msk.f32.vlgmr.msrb.gmra.mxu3 %vm160_vm0, %v2962_v25 }
 0x42e   :  { %2312 = vmatmul.msk.f32.gmra.mxu2 %vm160_vm0, %v2298_v38 }
 0x42f   :  { %2314 = vmatmul.msk.f32.gmra.mxu3 %vm160_vm0, %v2298_v38 }
 0x47a   :  { %v1461_v59 = vpop.f32.mrf.mxu1 }
 0x47b   :  { %2584 = vtanh.f32 %v1461_v59 }
 0x47d   :  { %v1438_v60 = vpop.f32.mrf.mxu0 }
 0x481   :  { %v2585_v63 = vpop.eup %2584 }
 0x482   :  { %v1464_v61 = vpop.f32.mrf.mxu1 }
 0x483   :  { %2586 = vtanh.f32 %v1464_v61 }
 0x484   :  { %2588 = vtanh.f32 %v1438_v60 }
 0x485   :  { %v1441_v62 = vpop.f32.mrf.mxu0 }
 0x486   :  { %2590 = vtanh.f32 %v1441_v62 }
 0x489   :  { %v2587_v0 = vpop.eup %2586 }
 0x48a   :  { %v2589_v1 = vpop.eup %2588  ;;  %1667 = vmatpush.msra.mxu1 %v2587_v0 }
 0x48c   :  { %v2591_v2 = vpop.eup %2590  ;;  %1668 = vmatpush.msra.mxu1 %v2585_v63 }
 0x48d   :  { %1644 = vmatpush.msra.mxu0 %v2591_v2  ;;  %2319 = vmatmul.msk.f32.vlgmr.msra.gmra.mxu1 %vm160_vm0, %v2994_v3 }
 0x48e   :  { %v1553_v4 = vpop.f32.mrf.mxu1 }
 0x48f   :  { %1645 = vmatpush.msra.mxu0 %v2589_v1  ;;  %2592 = vtanh.f32 %v1553_v4 }
 0x490   :  { %v1530_v5 = vpop.f32.mrf.mxu0  ;;  %2317 = vmatmul.msk.f32.vlgmr.msra.gmra.mxu0 %vm160_vm0, %v2994_v3 }
 0x495   :  { %2320 = vmatmul.msk.f32.gmra.mxu1 %vm160_vm0, %v2316_v10  ;;  %v2593_v15 = vpop.eup %2592 }
 0x496   :  { %v1556_v11 = vpop.f32.mrf.mxu1 }
 0x497   :  { %2594 = vtanh.f32 %v1556_v11 }
 0x498   :  { %2596 = vtanh.f32 %v1530_v5  ;;  %v1533_v12 = vpop.f32.mrf.mxu0  ;;  %2318 = vmatmul.msk.f32.gmra.mxu0 %vm160_vm0, %v2316_v10 }
 0x499   :  { %v1484_v13 = vpop.f32.mrf.mxu2  ;;  %2598 = vtanh.f32 %v1533_v12 }
 0x49a   :  { %v1507_v14 = vpop.f32.mrf.mxu3 }
 0x49d   :  { %v2595_v16 = vpop.eup %2594 }
 0x49e   :  { %v2597_v18 = vpop.eup %2596  ;;  %1759 = vmatpush.msrb.mxu1 %v2595_v16 }
 0x49f   :  { %v2599_v19 = vpop.eup %2598 }
 0x4a0   :  { %1736 = vmatpush.msrb.mxu0 %v2599_v19  ;;  %1760 = vmatpush.msrb.mxu1 %v2593_v15 }
 0x4a1   :  { %v1487_v22 = vpop.f32.mrf.mxu2  ;;  %2327 = vmatmul.msk.f32.vlgmr.msrb.gmra.mxu1 %vm160_vm0, %v2994_v3 }
 0x4a2   :  { %2600 = vtanh.f32 %v1487_v22  ;;  %v1510_v23 = vpop.f32.mrf.mxu3  ;;  %1737 = vmatpush.msrb.mxu0 %v2597_v18 }
 0x4a3   :  { %2602 = vtanh.f32 %v1510_v23  ;;  %2325 = vmatmul.msk.f32.vlgmr.msrb.gmra.mxu0 %vm160_vm0, %v2994_v3 }
 0x4a4   :  { %2604 = vtanh.f32 %v1484_v13 }
 0x4a5   :  { %2606 = vtanh.f32 %v1507_v14 }
 0x4a8   :  { %v2601_v26 = vpop.eup %2600 }
 0x4a9   :  { %v2603_v27 = vpop.eup %2602  ;;  %v1576_v28 = vpop.f32.mrf.mxu2  ;;  %1690 = vmatpush.msra.mxu2 %v2601_v26  ;;  %2328 = vmatmul.msk.f32.gmra.mxu1 %vm160_vm0, %v2316_v10 }
 0x4aa   :  { %v2605_v17 = vpop.eup %2604  ;;  %v1599_v29 = vpop.f32.mrf.mxu3  ;;  %1713 = vmatpush.msra.mxu3 %v2603_v27 }
 0x4ab   :  { %v2607_v30 = vpop.eup %2606  ;;  %1691 = vmatpush.msra.mxu2 %v2605_v17  ;;  %2326 = vmatmul.msk.f32.gmra.mxu0 %vm160_vm0, %v2316_v10 }
 0x4ac   :  { %1714 = vmatpush.msra.mxu3 %v2607_v30  ;;  %2321 = vmatmul.msk.f32.vlgmr.msra.gmra.mxu2 %vm160_vm0, %v2994_v3 }
 0x4ad   :  { %2323 = vmatmul.msk.f32.vlgmr.msra.gmra.mxu3 %vm160_vm0, %v2994_v3 }
 0x4b1   :  { %v1579_v31 = vpop.f32.mrf.mxu2 }
 0x4b2   :  { %2608 = vtanh.f32 %v1579_v31  ;;  %v1602_v20 = vpop.f32.mrf.mxu3 }
 0x4b3   :  { %2610 = vtanh.f32 %v1602_v20 }
 0x4b4   :  { %2612 = vtanh.f32 %v1576_v28  ;;  %2322 = vmatmul.msk.f32.gmra.mxu2 %vm160_vm0, %v2316_v10 }
 0x4b5   :  { %2614 = vtanh.f32 %v1599_v29  ;;  %2324 = vmatmul.msk.f32.gmra.mxu3 %vm160_vm0, %v2316_v10 }
 0x4b8   :  { %v2609_v32 = vpop.eup %2608 }
 0x4b9   :  { %v2611_v6 = vpop.eup %2610  ;;  %1782 = vmatpush.msrb.mxu2 %v2609_v32 }
 0x4ba   :  { %v2613_v7 = vpop.eup %2612  ;;  %1805 = vmatpush.msrb.mxu3 %v2611_v6 }
 0x4bb   :  { %v2615_v21 = vpop.eup %2614  ;;  %1783 = vmatpush.msrb.mxu2 %v2613_v7 }
 0x4bc   :  { %1806 = vmatpush.msrb.mxu3 %v2615_v21  ;;  %2329 = vmatmul.msk.f32.vlgmr.msrb.gmra.mxu2 %vm160_vm0, %v2994_v3 }
 0x4bd   :  { %2331 = vmatmul.msk.f32.vlgmr.msrb.gmra.mxu3 %vm160_vm0, %v2994_v3 }
 0x4c4   :  { %2330 = vmatmul.msk.f32.gmra.mxu2 %vm160_vm0, %v2316_v10 }
 0x4c5   :  { %2332 = vmatmul.msk.f32.gmra.mxu3 %vm160_vm0, %v2316_v10 }
 0x50a   :  { %v1670_v33 = vpop.f32.mrf.mxu1 }
 0x50b   :  { %2616 = vtanh.f32 %v1670_v33 }
 0x50d   :  { %v1647_v24 = vpop.f32.mrf.mxu0 }
 0x50e   :  { %2618 = vtanh.f32 %v1647_v24 }
 0x511   :  { %v2617_v25 = vpop.eup %2616 }
 0x512   :  { %v1673_v34 = vpop.f32.mrf.mxu1 }
 0x513   :  { %2620 = vtanh.f32 %v1673_v34 }
 0x514   :  { %v2619_v9 = vpop.eup %2618 }
 0x515   :  { %v1650_v8 = vpop.f32.mrf.mxu0 }
 0x516   :  { %2622 = vtanh.f32 %v1650_v8 }
 0x519   :  { %v2621_v35 = vpop.eup %2620 }
 0x51a   :  { %1869 = vmatpush.msra.mxu1 %v2621_v35 }
 0x51c   :  { %v2623_v36 = vpop.eup %2622  ;;  %1870 = vmatpush.msra.mxu1 %v2617_v25 }
 0x51d   :  { %1849 = vmatpush.msra.mxu0 %v2623_v36  ;;  %2335 = vmatmul.msk.f32.vlgmr.msra.gmra.mxu1 %vm160_vm0, %v2333_v39 }
 0x51e   :  { %v1762_v37 = vpop.f32.mrf.mxu1 }
 0x51f   :  { %1850 = vmatpush.msra.mxu0 %v2619_v9  ;;  %2624 = vtanh.f32 %v1762_v37 }
 0x520   :  { %v1739_v38 = vpop.f32.mrf.mxu0  ;;  %2334 = vmatmul.msk.f32.vlgmr.msra.gmra.mxu0 %vm160_vm0, %v2333_v39 }
 0x521   :  { %2626 = vtanh.f32 %v1739_v38 }
 0x525   :  { %v2625_v42 = vpop.eup %2624 }
 0x526   :  { %v1765_v40 = vpop.f32.mrf.mxu1 }
 0x527   :  { %2628 = vtanh.f32 %v1765_v40  ;;  %v2627_v44 = vpop.eup %2626 }
 0x528   :  { %v1742_v41 = vpop.f32.mrf.mxu0 }
 0x529   :  { %2630 = vtanh.f32 %v1742_v41 }
 0x52d   :  { %v2629_v46 = vpop.eup %2628 }
 0x52e   :  { %1949 = vmatpush.msrb.mxu1 %v2629_v46 }
 0x52f   :  { %v1693_v43 = vpop.f32.mrf.mxu2  ;;  %v2631_v47 = vpop.eup %2630 }
 0x530   :  { %v1716_v45 = vpop.f32.mrf.mxu3  ;;  %1929 = vmatpush.msrb.mxu0 %v2631_v47  ;;  %1950 = vmatpush.msrb.mxu1 %v2625_v42 }
 0x531   :  { %2339 = vmatmul.msk.f32.vlgmr.msrb.gmra.mxu1 %vm160_vm0, %v2333_v39 }
 0x532   :  { %1930 = vmatpush.msrb.mxu0 %v2627_v44 }
 0x533   :  { %2338 = vmatmul.msk.f32.vlgmr.msrb.gmra.mxu0 %vm160_vm0, %v2333_v39 }
 0x537   :  { %v1696_v48 = vpop.f32.mrf.mxu2 }
 0x538   :  { %2632 = vtanh.f32 %v1696_v48  ;;  %v1719_v49 = vpop.f32.mrf.mxu3 }
 0x539   :  { %2634 = vtanh.f32 %v1719_v49 }
 0x53a   :  { %2636 = vtanh.f32 %v1693_v43 }
 0x53b   :  { %2638 = vtanh.f32 %v1716_v45 }
 0x53e   :  { %v2633_v50 = vpop.eup %2632 }
 0x53f   :  { %v2635_v51 = vpop.eup %2634  ;;  %v1785_v52 = vpop.f32.mrf.mxu2  ;;  %1889 = vmatpush.msra.mxu2 %v2633_v50 }
 0x540   :  { %v2637_v53 = vpop.eup %2636  ;;  %v1808_v54 = vpop.f32.mrf.mxu3  ;;  %1909 = vmatpush.msra.mxu3 %v2635_v51 }
 0x541   :  { %v2639_v55 = vpop.eup %2638  ;;  %1890 = vmatpush.msra.mxu2 %v2637_v53 }
 0x542   :  { %1910 = vmatpush.msra.mxu3 %v2639_v55  ;;  %2336 = vmatmul.msk.f32.vlgmr.msra.gmra.mxu2 %vm160_vm0, %v2333_v39 }
 0x543   :  { %2337 = vmatmul.msk.f32.vlgmr.msra.gmra.mxu3 %vm160_vm0, %v2333_v39 }
 0x547   :  { %v1788_v56 = vpop.f32.mrf.mxu2 }
 0x548   :  { %2640 = vtanh.f32 %v1788_v56  ;;  %v1811_v57 = vpop.f32.mrf.mxu3 }
 0x549   :  { %2642 = vtanh.f32 %v1811_v57 }
 0x54a   :  { %2644 = vtanh.f32 %v1785_v52 }
 0x54b   :  { %2646 = vtanh.f32 %v1808_v54 }
 0x54e   :  { %v2641_v58 = vpop.eup %2640 }
 0x54f   :  { %v2643_v59 = vpop.eup %2642  ;;  %1969 = vmatpush.msrb.mxu2 %v2641_v58 }
 0x550   :  { %v2645_v60 = vpop.eup %2644  ;;  %1989 = vmatpush.msrb.mxu3 %v2643_v59 }
 0x551   :  { %v2647_v61 = vpop.eup %2646  ;;  %1970 = vmatpush.msrb.mxu2 %v2645_v60 }
 0x552   :  { %1990 = vmatpush.msrb.mxu3 %v2647_v61  ;;  %2340 = vmatmul.msk.f32.vlgmr.msrb.gmra.mxu2 %vm160_vm0, %v2333_v39 }
 0x553   :  { %2341 = vmatmul.msk.f32.vlgmr.msrb.gmra.mxu3 %vm160_vm0, %v2333_v39 }
 0x59a   :  { %v1872_v62 = vpop.f32.mrf.mxu1 }
 0x59b   :  { %v2343_v63 = vmul.f32 -1.442695, %v1872_v62 }
 0x59d   :  { %2648 = vpow2.f32 %v2343_v63  ;;  %v1852_v0 = vpop.f32.mrf.mxu0 }
 0x59e   :  { %v2342_v1 = vmul.f32 -1.442695, %v1852_v0 }
 0x5a0   :  { %2650 = vpow2.f32 %v2342_v1 }
 0x5a3   :  { %v2649_v2 = vpop.eup %2648 }
 0x5a4   :  { %v2020_v3 = vadd.f32 1.0, %v2649_v2 }
 0x5a6   :  { %2652 = vrcp.f32 %v2020_v3  ;;  %v2651_v11 = vpop.eup %2650  ;;  %vm2047_vm1 = vweird.f32 %v2020_v3  ;;  %v2053_v27 = vand.u32 2147483648, %v2020_v3  ;;  %v2051_v29 = vand.u32 2147483647, %v2020_v3 }
 0x5a7   :  { %v2019_v13 = vadd.f32 1.0, %v2651_v11 }
 0x5a8   :  { %v2054_v7 = vor.u32 1.1754944e-38, %v2053_v27  ;;  %vm3043_vm6 = vcmp.eq.f32.partialorder %v2051_v29, 8.507059e+37 }
 0x5a9   :  { %v2038_v20 = vand.u32 2147483648, %v2019_v13  ;;  %vm2032_vm4 = vweird.f32 %v2019_v13  ;;  %v2036_v6 = vand.u32 2147483647, %v2019_v13 }
 0x5ab   :  { %v2039_v25 = vor.u32 1.1754944e-38, %v2038_v20  ;;  %vm2037_vm9 = vcmp.eq.f32.partialorder %v2036_v6, 8.507059e+37 }
 0x5ac   :  { %v2653_v14 = vpop.eup %2652 }
 0x5ad   :  { %v2043_v15 = vmul.f32 %v2653_v14, %v2020_v3  ;;  %vm2048_vm2 = vweird.f32 %v2653_v14 }
 0x5ae   :  { %v1952_v4 = vpop.f32.mrf.mxu1  ;;  %vm3036_vm3 = vmor %vm2047_vm1, %vm2048_vm2 }
 0x5af   :  { %v2347_v5 = vmul.f32 -1.442695, %v1952_v4  ;;  %v2044_v18 = vsub.f32 1.0, %v2043_v15 }
 0x5b0   :  { %v1932_v10 = vpop.f32.mrf.mxu0 }
 0x5b1   :  { %2654 = vpow2.f32 %v2347_v5  ;;  %v2346_v12 = vmul.f32 -1.442695, %v1932_v10  ;;  %v2045_v23 = vmul.f32 %v2653_v14, %v2044_v18 }
 0x5b3   :  { %2656 = vpow2.f32 %v2346_v12  ;;  %v2046_v17 = vadd.f32 %v2653_v14, %v2045_v23 }
 0x5b4   :  { %2658 = vrcp.f32 %v2019_v13 }
 0x5b5   :  { %v2050_v21 = vsel %vm3036_vm3, %v2653_v14, %v2046_v17 }
 0x5b6   :  { %v2055_v42 = vsel %vm3043_vm6, %v2054_v7, %v2050_v21 }
 0x5b7   :  { %v2655_v16 = vpop.eup %2654  ;;  %v2155_v45 = vrot.slane %v2055_v42, 4 }
 0x5b8   :  { %v2024_v19 = vadd.f32 1.0, %v2655_v16 }
 0x5b9   :  { %v2657_v22 = vpop.eup %2656 }
 0x5ba   :  { %v2659_v26 = vpop.eup %2658  ;;  %2660 = vrcp.f32 %v2024_v19  ;;  %v3034_v28 = vadd.f32 1.0, %v2657_v22  ;;  %vm2107_vm8 = vweird.f32 %v2024_v19  ;;  %v2111_v35 = vand.u32 2147483647, %v2024_v19 }
 0x5bb   :  { %v2028_v30 = vmul.f32 %v2659_v26, %v2019_v13  ;;  %vm2033_vm5 = vweird.f32 %v2659_v26  ;;  %v2113_v41 = vand.u32 2147483648, %v2024_v19 }
 0x5bc   :  { %2662 = vrcp.f32 %v3034_v28  ;;  %vm3047_vm7 = vmor %vm2032_vm4, %vm2033_vm5  ;;  %vm2112_vm13 = vcmp.eq.f32.partialorder %v2111_v35, 8.507059e+37  ;;  %v2098_v55 = vand.u32 2147483648, %v3034_v28  ;;  %vm2092_vm14 = vweird.f32 %v3034_v28 }
 0x5bd   :  { %v2029_v32 = vsub.f32 1.0, %v2028_v30  ;;  %v2114_v52 = vor.u32 1.1754944e-38, %v2113_v41  ;;  %v2096_v61 = vand.u32 2147483647, %v3034_v28 }
 0x5be   :  { %v2099_v1 = vor.u32 1.1754944e-38, %v2098_v55 }
 0x5bf   :  { %v2030_v24 = vmul.f32 %v2659_v26, %v2029_v32  ;;  %vm2097_vm1 = vcmp.eq.f32.partialorder %v2096_v61, 8.507059e+37 }
 0x5c0   :  { %v2661_v34 = vpop.eup %2660 }
 0x5c1   :  { %v2031_v37 = vadd.f32 %v2659_v26, %v2030_v24  ;;  %v2103_v39 = vmul.f32 %v2661_v34, %v2024_v19  ;;  %vm2108_vm10 = vweird.f32 %v2661_v34 }
 0x5c2   :  { %v2663_v46 = vpop.eup %2662  ;;  %vm3058_vm12 = vmor %vm2107_vm8, %vm2108_vm10 }
 0x5c3   :  { %v2104_v43 = vsub.f32 1.0, %v2103_v39  ;;  %v2035_v44 = vsel %vm3047_vm7, %v2659_v26, %v2031_v37  ;;  %v2088_v49 = vmul.f32 %v2663_v46, %v3034_v28  ;;  %vm2093_vm15 = vweird.f32 %v2663_v46 }
 0x5c4   :  { %v2040_v47 = vsel %vm2037_vm9, %v2039_v25, %v2035_v44  ;;  %vm2094_vm0 = vmor %vm2092_vm14, %vm2093_vm15 }
 0x5c5   :  { %v1892_v9 = vpop.f32.mrf.mxu2  ;;  %v2105_v48 = vmul.f32 %v2661_v34, %v2104_v43  ;;  %v2160_v50 = vsel %vm2159_vm11, %v2040_v47, %v2155_v45  ;;  %v2089_v54 = vsub.f32 1.0, %v2088_v49 }
 0x5c6   :  { %v1912_v36 = vpop.f32.mrf.mxu3  ;;  %v2344_v38 = vmul.f32 -1.442695, %v1892_v9  ;;  %2168 = vst [vmem:[#allocation2] sm:$0x77] %v2160_v50 }
 0x5c7   :  { %v2345_v40 = vmul.f32 -1.442695, %v1912_v36  ;;  %v2106_v53 = vadd.f32 %v2661_v34, %v2105_v48  ;;  %v2090_v58 = vmul.f32 %v2663_v46, %v2089_v54 }
 0x5c8   :  { %2664 = vpow2.f32 %v2344_v38 }
 0x5c9   :  { %2666 = vpow2.f32 %v2345_v40  ;;  %v2110_v57 = vsel %vm3058_vm12, %v2661_v34, %v2106_v53  ;;  %v2091_v0 = vadd.f32 %v2663_v46, %v2090_v58 }
 0x5ca   :  { %v2115_v62 = vsel %vm2112_vm13, %v2114_v52, %v2110_v57 }
 0x5cb   :  { %v2157_v2 = vrot.slane %v2115_v62, 4  ;;  %v2095_v3 = vsel %vm2094_vm0, %v2663_v46, %v2091_v0 }
 0x5cc   :  { %v2100_v4 = vsel %vm2097_vm1, %v2099_v1, %v2095_v3 }
 0x5cd   :  { %v2162_v10 = vsel %vm2159_vm11, %v2100_v4, %v2157_v2 }
 0x5ce   :  { %v2665_v56 = vpop.eup %2664  ;;  %2170 = vst [vmem:[#allocation2 + $0x10] sm:$0x77] %v2162_v10 }
 0x5cf   :  { %v2667_v59 = vpop.eup %2666  ;;  %v2021_v60 = vadd.f32 1.0, %v2665_v56 }
 0x5d0   :  { %v2022_v63 = vadd.f32 1.0, %v2667_v59 }
 0x5d1   :  { %2668 = vrcp.f32 %v2021_v60  ;;  %vm2062_vm4 = vweird.f32 %v2021_v60  ;;  %v2068_v20 = vand.u32 2147483648, %v2021_v60  ;;  %v2066_v6 = vand.u32 2147483647, %v2021_v60 }
 0x5d2   :  { %2670 = vrcp.f32 %v2022_v63  ;;  %vm2077_vm2 = vweird.f32 %v2022_v63  ;;  %v2083_v27 = vand.u32 2147483648, %v2022_v63  ;;  %v2081_v17 = vand.u32 2147483647, %v2022_v63 }
 0x5d3   :  { %v2069_v34 = vor.u32 1.1754944e-38, %v2068_v20  ;;  %vm2067_vm9 = vcmp.eq.f32.partialorder %v2066_v6, 8.507059e+37 }
 0x5d4   :  { %v2084_v33 = vor.u32 1.1754944e-38, %v2083_v27  ;;  %vm2082_vm8 = vcmp.eq.f32.partialorder %v2081_v17, 8.507059e+37 }
 0x5d5   :  { %v1972_v5 = vpop.f32.mrf.mxu2 }
 0x5d6   :  { %v1992_v11 = vpop.f32.mrf.mxu3  ;;  %v2348_v12 = vmul.f32 -1.442695, %v1972_v5 }
 0x5d7   :  { %v2669_v13 = vpop.eup %2668  ;;  %v2349_v14 = vmul.f32 -1.442695, %v1992_v11 }
 0x5d8   :  { %v2671_v15 = vpop.eup %2670  ;;  %v2058_v16 = vmul.f32 %v2669_v13, %v2021_v60  ;;  %2672 = vpow2.f32 %v2348_v12  ;;  %vm2063_vm5 = vweird.f32 %v2669_v13 }
 0x5d9   :  { %v2073_v18 = vmul.f32 %v2671_v15, %v2022_v63  ;;  %2674 = vpow2.f32 %v2349_v14  ;;  %vm2078_vm3 = vweird.f32 %v2671_v15  ;;  %vm2064_vm7 = vmor %vm2062_vm4, %vm2063_vm5 }
 0x5da   :  { %v2059_v19 = vsub.f32 1.0, %v2058_v16  ;;  %vm2079_vm6 = vmor %vm2077_vm2, %vm2078_vm3 }
 0x5db   :  { %v2074_v22 = vsub.f32 1.0, %v2073_v18 }
 0x5dc   :  { %v2060_v23 = vmul.f32 %v2669_v13, %v2059_v19 }
 0x5dd   :  { %v2075_v26 = vmul.f32 %v2671_v15, %v2074_v22 }
 0x5de   :  { %v2673_v28 = vpop.eup %2672  ;;  %v2061_v29 = vadd.f32 %v2669_v13, %v2060_v23 }
 0x5df   :  { %v2675_v30 = vpop.eup %2674  ;;  %v2076_v31 = vadd.f32 %v2671_v15, %v2075_v26  ;;  %v2025_v32 = vadd.f32 1.0, %v2673_v28 }
 0x5e0   :  { %v2026_v7 = vadd.f32 1.0, %v2675_v30  ;;  %v2065_v24 = vsel %vm2064_vm7, %v2669_v13, %v2061_v29 }
 0x5e1   :  { %v2080_v21 = vsel %vm2079_vm6, %v2671_v15, %v2076_v31  ;;  %2676 = vrcp.f32 %v2025_v32  ;;  %v2070_v9 = vsel %vm2067_vm9, %v2069_v34, %v2065_v24  ;;  %vm2122_vm13 = vweird.f32 %v2025_v32 }
 0x5e2   :  { %2678 = vrcp.f32 %v2026_v7  ;;  %v2085_v8 = vsel %vm2082_vm8, %v2084_v33, %v2080_v21  ;;  %v2143_v42 = vand.u32 2147483648, %v2026_v7  ;;  %v2141_v45 = vand.u32 2147483647, %v2026_v7 }
 0x5e3   :  { %v2156_v25 = vrot.slane %v2085_v8, 4  ;;  %v2128_v47 = vand.u32 2147483648, %v2025_v32  ;;  %vm2137_vm14 = vweird.f32 %v2026_v7  ;;  %v2126_v49 = vand.u32 2147483647, %v2025_v32 }
 0x5e4   :  { %v2144_v50 = vor.u32 1.1754944e-38, %v2143_v42  ;;  %vm2142_vm1 = vcmp.eq.f32.partialorder %v2141_v45, 8.507059e+37 }
 0x5e5   :  { %v2161_v35 = vsel %vm2159_vm11, %v2070_v9, %v2156_v25  ;;  %v2129_v53 = vor.u32 1.1754944e-38, %v2128_v47  ;;  %vm2127_vm2 = vcmp.eq.f32.partialorder %v2126_v49, 8.507059e+37 }
 0x5e6   :  { %2169 = vst [vmem:[#allocation2 + $0x8] sm:$0x77] %v2161_v35 }
 0x5e7   :  { %v2677_v36 = vpop.eup %2676 }
 0x5e8   :  { %v2679_v37 = vpop.eup %2678  ;;  %v2118_v38 = vmul.f32 %v2677_v36, %v2025_v32  ;;  %vm2123_vm10 = vweird.f32 %v2677_v36 }
 0x5e9   :  { %v2133_v39 = vmul.f32 %v2679_v37, %v2026_v7  ;;  %vm2138_vm12 = vweird.f32 %v2679_v37  ;;  %vm2124_vm15 = vmor %vm2122_vm13, %vm2123_vm10 }
 0x5ea   :  { %v2119_v40 = vsub.f32 1.0, %v2118_v38  ;;  %vm2139_vm0 = vmor %vm2137_vm14, %vm2138_vm12 }
 0x5eb   :  { %v2134_v41 = vsub.f32 1.0, %v2133_v39 }
 0x5ec   :  { %v2120_v43 = vmul.f32 %v2677_v36, %v2119_v40 }
 0x5ed   :  { %v2135_v44 = vmul.f32 %v2679_v37, %v2134_v41 }
 0x5ee   :  { %v2121_v46 = vadd.f32 %v2677_v36, %v2120_v43 }
 0x5ef   :  { %v2136_v48 = vadd.f32 %v2679_v37, %v2135_v44 }
 0x5f0   :  { %v2125_v52 = vsel %vm2124_vm15, %v2677_v36, %v2121_v46 }
 0x5f1   :  { %v2140_v51 = vsel %vm2139_vm0, %v2679_v37, %v2136_v48  ;;  %v2130_v56 = vsel %vm2127_vm2, %v2129_v53, %v2125_v52 }
 0x5f2   :  { %v2145_v54 = vsel %vm2142_vm1, %v2144_v50, %v2140_v51 }
 0x5f3   :  { %v2158_v55 = vrot.slane %v2145_v54, 4 }
 0x5f5   :  { %v2163_v57 = vsel %vm2159_vm11, %v2130_v56, %v2158_v55 }
 0x5f6   :  { %2171 = vst [vmem:[#allocation2 + $0x18] sm:$0x77] %v2163_v57 }
 0x5f7   :  { %2182 = dma.vmem_to_hbm [thread:$0]  %s2178_s21, 512, %s2180_s24, [#allocation3]  }
 0x5f8   :  { %2704 = dma.done.wait [#allocation3], 512  }
 0x5f9   :  { %2705 = vsyncadd [#allocation3], 4294966784 }
 0x5fa   :  { %2187 = vsyncpa [#allocation3], 1 }

</bundles_post_ra>
